<compile_context>
chip_gen: v5e
topology: v5e:2x2
jax: 0.10.0
libtpu: 0.0.40
codegen_flags: <defaults>
</compile_context>

<pallas_src>
import functools

import jax
import jax.numpy as jnp
from jax import lax
from jax.experimental import pallas as pl
from jax.experimental.pallas import tpu as pltpu

C1 = 64    # conv1 output channels
C2 = 10    # conv2 output channels
K1P = 16   # conv1 contraction dim (9 taps) padded to 16 for clean tiling


def _edge_conv_kernel(xext_ref, mask_ref, w1t_ref, b1_ref, w2t_ref, b2_ref,
                      out_ref, x9_ref, y1ext_ref, im2col_ref, *, H, W):
    Hp, Wp = H + 2, W + 2
    Np = Hp * Wp                  # flattened padded spatial domain
    PADL = Wp + 1                 # max |flat shift| of a 3x3 tap
    Ne = Np + 2 * PADL            # extended axis of the conv1 activation
    # flat-axis offset of tap (dh, dw), rebased to be >= 0
    offs = [(dh - 1) * Wp + (dw - 1) + PADL for dh in range(3) for dw in range(3)]

    # ---- conv1: 1 -> 64 channels, 3x3, pad=1, ReLU (single MXU matmul) ----
    # Zero only the K-padding rows (9..15); the 9 tap rows are overwritten below.
    x9_ref[9:K1P, :] = jnp.zeros((K1P - 9, Ne), jnp.float32)
    for t, off in enumerate(offs):
        x9_ref[t:t + 1, :] = xext_ref[:, off:off + Ne]         # lane-shifted tap row
    y1 = jnp.dot(w1t_ref[...], x9_ref[...],                    # (64,16)@(16,Ne)
                 preferred_element_type=jnp.float32)
    # bias + ReLU, then zero the halo positions -> zero-padded conv2 input.
    y1ext_ref[...] = jnp.maximum(y1 + b1_ref[...], 0.0) * mask_ref[...]

    # ---- conv2: 64 -> 10 channels, 3x3, pad=1, ReLU (fused im2col matmul) ----
    # im2col written exactly once via 9 explicit shifted stores.
    for t, off in enumerate(offs):
        im2col_ref[t * C1:(t + 1) * C1, :] = y1ext_ref[:, off:off + Np]
    acc = jnp.dot(w2t_ref[...], im2col_ref[...],               # (10,576)@(576,Np)
                  preferred_element_type=jnp.float32)
    out_ref[...] = jnp.maximum(acc + b2_ref[...], 0.0)         # lane-dense (10, Np)


def edge_convolution_model(x, w1_hwio, b1, w2_hwio, b2):
    """x: (H, W) float32.  Returns (10, H, W), matching the PyTorch forward."""
    H, W = x.shape
    Hp, Wp = H + 2, W + 2
    Np = Hp * Wp
    PADL = Wp + 1
    Ne = Np + 2 * PADL
    Nx = Np + 4 * PADL

    x = x.astype(jnp.float32)
    # conv-padded input, flattened, with extra zeros so every tap shift is a
    # plain in-bounds static slice inside the kernel.
    xpad = jnp.pad(x, ((1, 1), (1, 1)))                                   # (Hp, Wp)
    xext = jnp.pad(xpad.reshape(1, Np), ((0, 0), (2 * PADL, 2 * PADL)))   # (1, Nx)
    # interior mask over the extended conv1-activation axis
    mask = jnp.pad(jnp.ones((H, W), jnp.float32), ((1, 1), (1, 1)))       # (Hp, Wp)
    maskext = jnp.pad(mask.reshape(1, Np), ((0, 0), (PADL, PADL)))        # (1, Ne)

    # weights in channel-major ("transposed") form so both matmul outputs are
    # lane-dense; conv1 K padded 9 -> 16 with zeros.
    w1t = jnp.pad(w1_hwio.reshape(9, C1).astype(jnp.float32).T,
                  ((0, 0), (0, K1P - 9)))                                 # (64, 16)
    w2t = w2_hwio.reshape(9 * C1, C2).astype(jnp.float32).T               # (10, 576)
    b1col = b1.reshape(C1, 1).astype(jnp.float32)
    b2col = b2.reshape(C2, 1).astype(jnp.float32)

    kernel = functools.partial(_edge_conv_kernel, H=H, W=W)
    vmem = pl.BlockSpec(memory_space=pltpu.MemorySpace.VMEM)
    flops = int(2 * Np * 9 * C1 * (1 + C2))
    bytes_accessed = int(4 * (Nx + Ne + w1t.size + C1 + w2t.size + C2 + C2 * Np))

    out = pl.pallas_call(
        kernel,
        out_shape=jax.ShapeDtypeStruct((C2, Np), jnp.float32),
        in_specs=[vmem] * 6,
        out_specs=vmem,
        scratch_shapes=[pltpu.VMEM((K1P, Ne), jnp.float32),      # conv1 tap matrix
                        pltpu.VMEM((C1, Ne), jnp.float32),       # conv1 activation (extended)
                        pltpu.VMEM((9 * C1, Np), jnp.float32)],  # conv2 im2col
        compiler_params=pltpu.CompilerParams(vmem_limit_bytes=32 * 1024 * 1024),
        cost_estimate=pl.CostEstimate(flops=flops, transcendentals=0,
                                      bytes_accessed=bytes_accessed),
    )(xext, maskext, w1t, b1col, w2t, b2col)

    # (10, Np) -> (10, Hp, Wp) -> interior (10, H, W)  ==  x.view(10, H, W) in torch
    return out.reshape(C2, Hp, Wp)[:, 1:1 + H, 1:1 + W]


def _reference(x, w1_hwio, b1, w2_hwio, b2):
    """Pure-JAX reference of the PyTorch forward (NCHW convs)."""
    xn = x[None, None].astype(jnp.float32)  # (1, 1, H, W)
    y1 = lax.conv_general_dilated(xn, w1_hwio, (1, 1), 'SAME',
                                  dimension_numbers=('NCHW', 'HWIO', 'NCHW'))
    y1 = jnp.maximum(y1 + b1[None, :, None, None], 0.0)
    y2 = lax.conv_general_dilated(y1, w2_hwio, (1, 1), 'SAME',
                                  dimension_numbers=('NCHW', 'HWIO', 'NCHW'))
    y2 = jnp.maximum(y2 + b2[None, :, None, None], 0.0)
    return y2[0]  # (10, H, W)


if __name__ == "__main__":
    key = jax.random.PRNGKey(0)
    k1, k2, k3, k4, k5 = jax.random.split(key, 5)

    H, W = 16, 16
    x = jax.random.normal(k1, (H, W), jnp.float32)
    # Deterministic synthetic parameters (HWIO layout), same shapes as
    # nn.Conv2d(1, 64, 3) / nn.Conv2d(64, 10, 3) weights + biases.
    w1 = jax.random.normal(k2, (3, 3, 1, C1), jnp.float32) * 0.1
    b1 = jax.random.normal(k3, (C1,), jnp.float32) * 0.1
    w2 = jax.random.normal(k4, (3, 3, C1, C2), jnp.float32) * 0.05
    b2 = jax.random.normal(k5, (C2,), jnp.float32) * 0.1

    y = edge_convolution_model(x, w1, b1, w2, b2)
    y = jax.block_until_ready(y)
    assert y.shape == (C2, H, W), y.shape

    r = _reference(x, w1, b1, w2, b2)
    max_err = float(jnp.max(jnp.abs(y - r)))
    assert jnp.allclose(y, r, atol=1e-4, rtol=1e-4), f"max abs err {max_err}"

    print("KERNEL_OK")
</pallas_src>

<mosaic_0001>
module attributes {stable_mosaic.version = 11 : i64} {
  func.func @_edge_conv_kernel(%arg0: memref<1x400xf32, #tpu.memory_space<vmem>>, %arg1: memref<1x362xf32, #tpu.memory_space<vmem>>, %arg2: memref<64x16xf32, #tpu.memory_space<vmem>>, %arg3: memref<64x1xf32, #tpu.memory_space<vmem>>, %arg4: memref<10x576xf32, #tpu.memory_space<vmem>>, %arg5: memref<10x1xf32, #tpu.memory_space<vmem>>, %arg6: memref<10x324xf32, #tpu.memory_space<vmem>>, %arg7: memref<16x362xf32, #tpu.memory_space<vmem>>, %arg8: memref<64x362xf32, #tpu.memory_space<vmem>>, %arg9: memref<576x324xf32, #tpu.memory_space<vmem>>) attributes {dimension_semantics = [], scalar_prefetch = 0 : i64, scratch_operands = 3 : i64, tpu.core_type = #tpu.core_type<tc>} {
    %cst = arith.constant 0.000000e+00 : f32
    %0 = vector.broadcast %cst : f32 to vector<7x362xf32>
    %c9 = arith.constant 9 : index
    %c0 = arith.constant 0 : index
    %1 = vector.load %arg7[%c9, %c0] : memref<16x362xf32, #tpu.memory_space<vmem>>, vector<7x362xf32>
    tpu.vector_store %arg7[%c9, %c0], %0 {strides = array<i32>} : memref<16x362xf32, #tpu.memory_space<vmem>>, vector<7x362xf32>,
    %c0_0 = arith.constant 0 : index
    %c0_1 = arith.constant 0 : index
    %2 = vector.load %arg0[%c0_0, %c0_1] : memref<1x400xf32, #tpu.memory_space<vmem>>, vector<1x362xf32>
    %c0_2 = arith.constant 0 : index
    %c0_3 = arith.constant 0 : index
    %3 = vector.load %arg7[%c0_2, %c0_3] : memref<16x362xf32, #tpu.memory_space<vmem>>, vector<1x362xf32>
    tpu.vector_store %arg7[%c0_2, %c0_3], %2 {strides = array<i32>} : memref<16x362xf32, #tpu.memory_space<vmem>>, vector<1x362xf32>,
    %c0_4 = arith.constant 0 : index
    %c1 = arith.constant 1 : index
    %4 = vector.load %arg0[%c0_4, %c1] : memref<1x400xf32, #tpu.memory_space<vmem>>, vector<1x362xf32>
    %c1_5 = arith.constant 1 : index
    %c0_6 = arith.constant 0 : index
    %5 = vector.load %arg7[%c1_5, %c0_6] : memref<16x362xf32, #tpu.memory_space<vmem>>, vector<1x362xf32>
    tpu.vector_store %arg7[%c1_5, %c0_6], %4 {strides = array<i32>} : memref<16x362xf32, #tpu.memory_space<vmem>>, vector<1x362xf32>,
    %c0_7 = arith.constant 0 : index
    %c2 = arith.constant 2 : index
    %6 = vector.load %arg0[%c0_7, %c2] : memref<1x400xf32, #tpu.memory_space<vmem>>, vector<1x362xf32>
    %c2_8 = arith.constant 2 : index
    %c0_9 = arith.constant 0 : index
    %7 = vector.load %arg7[%c2_8, %c0_9] : memref<16x362xf32, #tpu.memory_space<vmem>>, vector<1x362xf32>
    tpu.vector_store %arg7[%c2_8, %c0_9], %6 {strides = array<i32>} : memref<16x362xf32, #tpu.memory_space<vmem>>, vector<1x362xf32>,
    %c0_10 = arith.constant 0 : index
    %c18 = arith.constant 18 : index
    %8 = vector.load %arg0[%c0_10, %c18] : memref<1x400xf32, #tpu.memory_space<vmem>>, vector<1x362xf32>
    %c3 = arith.constant 3 : index
    %c0_11 = arith.constant 0 : index
    %9 = vector.load %arg7[%c3, %c0_11] : memref<16x362xf32, #tpu.memory_space<vmem>>, vector<1x362xf32>
    tpu.vector_store %arg7[%c3, %c0_11], %8 {strides = array<i32>} : memref<16x362xf32, #tpu.memory_space<vmem>>, vector<1x362xf32>,
    %c0_12 = arith.constant 0 : index
    %c19 = arith.constant 19 : index
    %10 = vector.load %arg0[%c0_12, %c19] : memref<1x400xf32, #tpu.memory_space<vmem>>, vector<1x362xf32>
    %c4 = arith.constant 4 : index
    %c0_13 = arith.constant 0 : index
    %11 = vector.load %arg7[%c4, %c0_13] : memref<16x362xf32, #tpu.memory_space<vmem>>, vector<1x362xf32>
    tpu.vector_store %arg7[%c4, %c0_13], %10 {strides = array<i32>} : memref<16x362xf32, #tpu.memory_space<vmem>>, vector<1x362xf32>,
    %c0_14 = arith.constant 0 : index
    %c20 = arith.constant 20 : index
    %12 = vector.load %arg0[%c0_14, %c20] : memref<1x400xf32, #tpu.memory_space<vmem>>, vector<1x362xf32>
    %c5 = arith.constant 5 : index
    %c0_15 = arith.constant 0 : index
    %13 = vector.load %arg7[%c5, %c0_15] : memref<16x362xf32, #tpu.memory_space<vmem>>, vector<1x362xf32>
    tpu.vector_store %arg7[%c5, %c0_15], %12 {strides = array<i32>} : memref<16x362xf32, #tpu.memory_space<vmem>>, vector<1x362xf32>,
    %c0_16 = arith.constant 0 : index
    %c36 = arith.constant 36 : index
    %14 = vector.load %arg0[%c0_16, %c36] : memref<1x400xf32, #tpu.memory_space<vmem>>, vector<1x362xf32>
    %c6 = arith.constant 6 : index
    %c0_17 = arith.constant 0 : index
    %15 = vector.load %arg7[%c6, %c0_17] : memref<16x362xf32, #tpu.memory_space<vmem>>, vector<1x362xf32>
    tpu.vector_store %arg7[%c6, %c0_17], %14 {strides = array<i32>} : memref<16x362xf32, #tpu.memory_space<vmem>>, vector<1x362xf32>,
    %c0_18 = arith.constant 0 : index
    %c37 = arith.constant 37 : index
    %16 = vector.load %arg0[%c0_18, %c37] : memref<1x400xf32, #tpu.memory_space<vmem>>, vector<1x362xf32>
    %c7 = arith.constant 7 : index
    %c0_19 = arith.constant 0 : index
    %17 = vector.load %arg7[%c7, %c0_19] : memref<16x362xf32, #tpu.memory_space<vmem>>, vector<1x362xf32>
    tpu.vector_store %arg7[%c7, %c0_19], %16 {strides = array<i32>} : memref<16x362xf32, #tpu.memory_space<vmem>>, vector<1x362xf32>,
    %c0_20 = arith.constant 0 : index
    %c38 = arith.constant 38 : index
    %18 = vector.load %arg0[%c0_20, %c38] : memref<1x400xf32, #tpu.memory_space<vmem>>, vector<1x362xf32>
    %c8 = arith.constant 8 : index
    %c0_21 = arith.constant 0 : index
    %19 = vector.load %arg7[%c8, %c0_21] : memref<16x362xf32, #tpu.memory_space<vmem>>, vector<1x362xf32>
    tpu.vector_store %arg7[%c8, %c0_21], %18 {strides = array<i32>} : memref<16x362xf32, #tpu.memory_space<vmem>>, vector<1x362xf32>,
    %c0_22 = arith.constant 0 : index
    %c0_23 = arith.constant 0 : index
    %20 = vector.load %arg2[%c0_22, %c0_23] : memref<64x16xf32, #tpu.memory_space<vmem>>, vector<64x16xf32>
    %c0_24 = arith.constant 0 : index
    %c0_25 = arith.constant 0 : index
    %21 = vector.load %arg7[%c0_24, %c0_25] : memref<16x362xf32, #tpu.memory_space<vmem>>, vector<16x362xf32>
    %cst_26 = arith.constant dense<0.000000e+00> : vector<64x362xf32>
    %22 = tpu.matmul %20, %21, %cst_26 {dimension_numbers = #tpu.dot_dimension_numbers<[1], [0], [0], [1], [0, 0, 1, 1], [], []>} : vector<64x16xf32>, vector<16x362xf32>, vector<64x362xf32> -> vector<64x362xf32>
    %c0_27 = arith.constant 0 : index
    %c0_28 = arith.constant 0 : index
    %23 = vector.load %arg3[%c0_27, %c0_28] : memref<64x1xf32, #tpu.memory_space<vmem>>, vector<64x1xf32>
    %24 = vector.broadcast %23 : vector<64x1xf32> to vector<64x362xf32>
    %25 = arith.addf %22, %24 : vector<64x362xf32>
    %cst_29 = arith.constant 0.000000e+00 : f32
    %26 = vector.broadcast %cst_29 : f32 to vector<64x362xf32>
    %27 = arith.maximumf %25, %26 : vector<64x362xf32>
    %c0_30 = arith.constant 0 : index
    %c0_31 = arith.constant 0 : index
    %28 = vector.load %arg1[%c0_30, %c0_31] : memref<1x362xf32, #tpu.memory_space<vmem>>, vector<1x362xf32>
    %29 = vector.broadcast %28 : vector<1x362xf32> to vector<64x362xf32>
    %30 = arith.mulf %27, %29 : vector<64x362xf32>
    %c0_32 = arith.constant 0 : index
    %c0_33 = arith.constant 0 : index
    %31 = vector.load %arg8[%c0_32, %c0_33] : memref<64x362xf32, #tpu.memory_space<vmem>>, vector<64x362xf32>
    tpu.vector_store %arg8[%c0_32, %c0_33], %30 {strides = array<i32>} : memref<64x362xf32, #tpu.memory_space<vmem>>, vector<64x362xf32>,
    %c0_34 = arith.constant 0 : index
    %c0_35 = arith.constant 0 : index
    %32 = vector.load %arg8[%c0_34, %c0_35] : memref<64x362xf32, #tpu.memory_space<vmem>>, vector<64x324xf32>
    %c0_36 = arith.constant 0 : index
    %c0_37 = arith.constant 0 : index
    %33 = vector.load %arg9[%c0_36, %c0_37] : memref<576x324xf32, #tpu.memory_space<vmem>>, vector<64x324xf32>
    tpu.vector_store %arg9[%c0_36, %c0_37], %32 {strides = array<i32>} : memref<576x324xf32, #tpu.memory_space<vmem>>, vector<64x324xf32>,
    %c0_38 = arith.constant 0 : index
    %c1_39 = arith.constant 1 : index
    %34 = vector.load %arg8[%c0_38, %c1_39] : memref<64x362xf32, #tpu.memory_space<vmem>>, vector<64x324xf32>
    %c64 = arith.constant 64 : index
    %c0_40 = arith.constant 0 : index
    %35 = vector.load %arg9[%c64, %c0_40] : memref<576x324xf32, #tpu.memory_space<vmem>>, vector<64x324xf32>
    tpu.vector_store %arg9[%c64, %c0_40], %34 {strides = array<i32>} : memref<576x324xf32, #tpu.memory_space<vmem>>, vector<64x324xf32>,
    %c0_41 = arith.constant 0 : index
    %c2_42 = arith.constant 2 : index
    %36 = vector.load %arg8[%c0_41, %c2_42] : memref<64x362xf32, #tpu.memory_space<vmem>>, vector<64x324xf32>
    %c128 = arith.constant 128 : index
    %c0_43 = arith.constant 0 : index
    %37 = vector.load %arg9[%c128, %c0_43] : memref<576x324xf32, #tpu.memory_space<vmem>>, vector<64x324xf32>
    tpu.vector_store %arg9[%c128, %c0_43], %36 {strides = array<i32>} : memref<576x324xf32, #tpu.memory_space<vmem>>, vector<64x324xf32>,
    %c0_44 = arith.constant 0 : index
    %c18_45 = arith.constant 18 : index
    %38 = vector.load %arg8[%c0_44, %c18_45] : memref<64x362xf32, #tpu.memory_space<vmem>>, vector<64x324xf32>
    %c192 = arith.constant 192 : index
    %c0_46 = arith.constant 0 : index
    %39 = vector.load %arg9[%c192, %c0_46] : memref<576x324xf32, #tpu.memory_space<vmem>>, vector<64x324xf32>
    tpu.vector_store %arg9[%c192, %c0_46], %38 {strides = array<i32>} : memref<576x324xf32, #tpu.memory_space<vmem>>, vector<64x324xf32>,
    %c0_47 = arith.constant 0 : index
    %c19_48 = arith.constant 19 : index
    %40 = vector.load %arg8[%c0_47, %c19_48] : memref<64x362xf32, #tpu.memory_space<vmem>>, vector<64x324xf32>
    %c256 = arith.constant 256 : index
    %c0_49 = arith.constant 0 : index
    %41 = vector.load %arg9[%c256, %c0_49] : memref<576x324xf32, #tpu.memory_space<vmem>>, vector<64x324xf32>
    tpu.vector_store %arg9[%c256, %c0_49], %40 {strides = array<i32>} : memref<576x324xf32, #tpu.memory_space<vmem>>, vector<64x324xf32>,
    %c0_50 = arith.constant 0 : index
    %c20_51 = arith.constant 20 : index
    %42 = vector.load %arg8[%c0_50, %c20_51] : memref<64x362xf32, #tpu.memory_space<vmem>>, vector<64x324xf32>
    %c320 = arith.constant 320 : index
    %c0_52 = arith.constant 0 : index
    %43 = vector.load %arg9[%c320, %c0_52] : memref<576x324xf32, #tpu.memory_space<vmem>>, vector<64x324xf32>
    tpu.vector_store %arg9[%c320, %c0_52], %42 {strides = array<i32>} : memref<576x324xf32, #tpu.memory_space<vmem>>, vector<64x324xf32>,
    %c0_53 = arith.constant 0 : index
    %c36_54 = arith.constant 36 : index
    %44 = vector.load %arg8[%c0_53, %c36_54] : memref<64x362xf32, #tpu.memory_space<vmem>>, vector<64x324xf32>
    %c384 = arith.constant 384 : index
    %c0_55 = arith.constant 0 : index
    %45 = vector.load %arg9[%c384, %c0_55] : memref<576x324xf32, #tpu.memory_space<vmem>>, vector<64x324xf32>
    tpu.vector_store %arg9[%c384, %c0_55], %44 {strides = array<i32>} : memref<576x324xf32, #tpu.memory_space<vmem>>, vector<64x324xf32>,
    %c0_56 = arith.constant 0 : index
    %c37_57 = arith.constant 37 : index
    %46 = vector.load %arg8[%c0_56, %c37_57] : memref<64x362xf32, #tpu.memory_space<vmem>>, vector<64x324xf32>
    %c448 = arith.constant 448 : index
    %c0_58 = arith.constant 0 : index
    %47 = vector.load %arg9[%c448, %c0_58] : memref<576x324xf32, #tpu.memory_space<vmem>>, vector<64x324xf32>
    tpu.vector_store %arg9[%c448, %c0_58], %46 {strides = array<i32>} : memref<576x324xf32, #tpu.memory_space<vmem>>, vector<64x324xf32>,
    %c0_59 = arith.constant 0 : index
    %c38_60 = arith.constant 38 : index
    %48 = vector.load %arg8[%c0_59, %c38_60] : memref<64x362xf32, #tpu.memory_space<vmem>>, vector<64x324xf32>
    %c512 = arith.constant 512 : index
    %c0_61 = arith.constant 0 : index
    %49 = vector.load %arg9[%c512, %c0_61] : memref<576x324xf32, #tpu.memory_space<vmem>>, vector<64x324xf32>
    tpu.vector_store %arg9[%c512, %c0_61], %48 {strides = array<i32>} : memref<576x324xf32, #tpu.memory_space<vmem>>, vector<64x324xf32>,
    %c0_62 = arith.constant 0 : index
    %c0_63 = arith.constant 0 : index
    %50 = vector.load %arg4[%c0_62, %c0_63] : memref<10x576xf32, #tpu.memory_space<vmem>>, vector<10x576xf32>
    %c0_64 = arith.constant 0 : index
    %c0_65 = arith.constant 0 : index
    %51 = vector.load %arg9[%c0_64, %c0_65] : memref<576x324xf32, #tpu.memory_space<vmem>>, vector<576x324xf32>
    %cst_66 = arith.constant dense<0.000000e+00> : vector<10x324xf32>
    %52 = tpu.matmul %50, %51, %cst_66 {dimension_numbers = #tpu.dot_dimension_numbers<[1], [0], [0], [1], [0, 0, 1, 1], [], []>} : vector<10x576xf32>, vector<576x324xf32>, vector<10x324xf32> -> vector<10x324xf32>
    %c0_67 = arith.constant 0 : index
    %c0_68 = arith.constant 0 : index
    %53 = vector.load %arg5[%c0_67, %c0_68] : memref<10x1xf32, #tpu.memory_space<vmem>>, vector<10x1xf32>
    %54 = vector.broadcast %53 : vector<10x1xf32> to vector<10x324xf32>
    %55 = arith.addf %52, %54 : vector<10x324xf32>
    %cst_69 = arith.constant 0.000000e+00 : f32
    %56 = vector.broadcast %cst_69 : f32 to vector<10x324xf32>
    %57 = arith.maximumf %55, %56 : vector<10x324xf32>
    %c0_70 = arith.constant 0 : index
    %c0_71 = arith.constant 0 : index
    %58 = vector.load %arg6[%c0_70, %c0_71] : memref<10x324xf32, #tpu.memory_space<vmem>>, vector<10x324xf32>
    tpu.vector_store %arg6[%c0_70, %c0_71], %57 {strides = array<i32>} : memref<10x324xf32, #tpu.memory_space<vmem>>, vector<10x324xf32>,
    return
  }
}

</mosaic_0001>

<bundles_post_ra>
// kernel: tpu_custom_call.1
= control target key start
LH: loop header
LB: loop body
LE: loop exit
PB: predicated region body
PF: predicated region fallthrough
CT: control target
= control target key end

     0   :  { %s2452_s25 = smov 110   ;;  %s2453_s26 = smov 127   ;;  %s3766_s0 = inlined_call_operand.vmem [shape: f32[1,400], index: 0, kind: input, shape index: {}]   ;;  %s3767_s1 = inlined_call_operand.vmem [shape: f32[1,362], index: 1, kind: input, shape index: {}]   ;;  %s3768_s2 = inlined_call_operand.vmem [shape: f32[64,16], index: 2, kind: input, shape index: {}]   ;;  %s3769_s3 = inlined_call_operand.vmem [shape: f32[64,1], index: 3, kind: input, shape index: {}]   ;;  %s3770_s4 = inlined_call_operand.vmem [shape: f32[10,576], index: 4, kind: input, shape index: {}]   ;;  %s3771_s5 = inlined_call_operand.vmem [shape: f32[10,1], index: 5, kind: input, shape index: {}]   ;;  %s3772_s6 = inlined_call_operand.hbm [shape: f32[10,324], index: 6, kind: output, shape index: {}]  }
   0x1   :  { %v57_v0 = vld [vmem:[%s3766_s0] sm:$0x7]  ;;  %s2454_s29 = smov 108  }
   0x2   :  { %v35_v1 = vld [vmem:[%s3766_s0] sm:$0x7]  ;;  %59 = vrot.lane.b32.xlu1 %v57_v0, %s2452_s25 }
   0x3   :  { %37 = vrot.lane.b32.xlu0 %v35_v1, %s2453_s26  ;;  %v79_v2 = vld [vmem:[%s3766_s0] sm:$0x7] }
   0x4   :  { %81 = vrot.lane.b32.xlu2 %v79_v2, %s2454_s29 }
   0x5   :  { %11 = vsyncpa [#allocation6], 0  ;;  %v68_v3 = vld [vmem:[%s3766_s0] sm:$0x7]  ;;  %s2455_s10 = smov 109   ;;  %s2456_s11 = smov 126   ;;  %v29_v8 = vlaneseq }
   0x6   :  { %v46_v4 = vld [vmem:[%s3766_s0] sm:$0x7]  ;;  %s2457_s14 = smov 92   ;;  %s2458_s19 = smov 90   ;;  %vm84_vm0 = vcmask 883712   ;;  %vm95_vm2 = vcmask 752640  }
   0x7   :  { %v90_v5 = vld [vmem:[%s3766_s0] sm:$0xf]  ;;  %s2459_s20 = smov 91   ;;  %vm2532_vm1 = vcmp.lt.s32.totalorder %v29_v8, 362  ;;  %v139_v15 = vld [vmem:[%s3769_s3 + $0x10] sm:$0xff]  ;;  %v2460_v16 = vmov 0.0  }
   0x8   :  { %v112_v6 = vld [vmem:[%s3766_s0] sm:$0xf]  ;;  %24 = vst [vmem:[#allocation2 + $0x18] sm:$0xfe] %v2460_v16  ;;  %vm26_vm3 = vcmask 867329   ;;  %v2461_v18 = vmov 0  }
   0x9   :  { %v101_v7 = vld [vmem:[%s3766_s0] sm:$0xf]  ;;  %2411 = vset.pattern.permute.xlu1 %v2461_v18  ;;  %25 = vst [vmem:[#allocation2 + $0x20] sm:$0xfe] %v2460_v16  ;;  %2409 = vset.pattern.permute.xlu2 %v2461_v18  ;;  %vm62_vm4 = vcmask 900096   ;;  %vm40_vm5 = vcmask 1039360  }
   0xa   :  { %70 = vrot.lane.b32.xlu1 %v68_v3, %s2455_s10  ;;  %v28_v19 = vld [vmem:[%s3766_s0] sm:$0x7]  ;;  %2410 = vset.pattern.permute.xlu0 %v2461_v18  ;;  %27 = vst.msk [vmem:[#allocation2 + $0x28] sm:$0xfe] %vm26_vm3, %v2460_v16  ;;  %vm73_vm6 = vcmask 891904   ;;  %vm51_vm7 = vcmask 1031168  }
   0xb   :  { %48 = vrot.lane.b32.xlu0 %v46_v4, %s2456_s11  ;;  %33 = vst.msk [vmem:[#allocation2] ss:$8 sm:$0x7] %vm2532_vm1, %v28_v19  ;;  %v141_v26 = vld [vmem:[%s3769_s3 + $0x20] sm:$0xff]  ;;  %v144_v31 = vld [vmem:[%s3769_s3 + $0x38] sm:$0xff]  ;;  %vm117_vm8 = vcmask 736256  }
   0xc   :  { %92 = vrot.lane.b32.xlu2 %v90_v5, %s2457_s14  ;;  %vm106_vm9 = vcmask 744448   ;;  %v137_v40 = vld [vmem:[%s3769_s3] sm:$0xff]  ;;  %vm185_vm10 = vcmask 130048   ;;  %v130_v45 = vld [vmem:[%s3768_s2 + $0x38] sm:$0xff]  ;;  %v124_v50 = vld [vmem:[%s3768_s2 + $0x8] sm:$0xff]  ;;  %vm391_vm11 = vcmask 867328  }
   0xd   :  { %v123_v43 = vld [vmem:[%s3768_s2] sm:$0xff]  ;;  %v140_v48 = vld [vmem:[%s3769_s3 + $0x18] sm:$0xff]  ;;  %v142_v51 = vld [vmem:[%s3769_s3 + $0x28] sm:$0xff]  ;;  %vm440_vm12 = vcmask 556032   ;;  %vm1981_vm13 = vcmask 523264   ;;  %s2352_s18 = sshll.u32 %s3772_s6, 4  ;;  %s2353_s18 = int_to_ptr.hbm [resolvable:$true] %s2352_s18 }
   0xe   :  { %v125_v52 = vld [vmem:[%s3768_s2 + $0x10] sm:$0xff]  ;;  %v138_v53 = vld [vmem:[%s3769_s3 + $0x8] sm:$0xff]  ;;  %v126_v54 = vld [vmem:[%s3768_s2 + $0x18] sm:$0xff]  ;;  %vm2344_vm14 = vcmask 549888   ;;  %s2463_s21 = smov 384  }
   0xf   :  { %v143_v55 = vld [vmem:[%s3769_s3 + $0x30] sm:$0xff]  ;;  %v127_v56 = vld [vmem:[%s3768_s2 + $0x20] sm:$0xff]  ;;  %v128_v57 = vld [vmem:[%s3768_s2 + $0x28] sm:$0xff] }
  0x10   :  { %v129_v58 = vld [vmem:[%s3768_s2 + $0x30] sm:$0xff]  ;;  %v357_v61 = vld [vmem:[%s3767_s1] sm:$0x7]  ;;  %s2464_s1 = smov 24  }
  0x11   :  { %v2646_v2 = vperm.slane %v357_v61, 0  ;;  %v2659_v11 = vperm.slane %v357_v61, 2  ;;  %v2661_v16 = vperm.slane %v357_v61, 1 }
  0x12   :  { %114 = vrot.lane.b32.xlu1 %v112_v6, %s2458_s19 }
  0x13   :  { %103 = vrot.lane.b32.xlu0 %v101_v7, %s2459_s20 }
  0x14   :  { %147 = vperm.xlu2 %2409, %v137_v40  }
  0x1a   :  { %157 = vperm.xlu1 %2411, %v139_v15  }
  0x1b   :  { %152 = vperm.xlu0 %2410, %v138_v53  }
  0x1c   :  { %162 = vperm.xlu2 %2409, %v140_v48  }
  0x22   :  { %167 = vperm.xlu1 %2411, %v141_v26  }
  0x23   :  { %177 = vperm.xlu0 %2410, %v143_v55  }
  0x24   :  { %172 = vperm.xlu2 %2409, %v142_v51  }
  0x2a   :  { %182 = vperm.xlu1 %2411, %v144_v31  }
  0x5e   :  { %v82_v9 = vpop.permute.xlu2 %81 }
  0x5f   :  { %v83_v10 = vrot.slane %v82_v9, 1 }
  0x61   :  { %v85_v12 = vsel %vm84_vm0, %v82_v9, %v83_v10 }
  0x62   :  { %88 = vst.msk [vmem:[#allocation2 + $0x5] ss:$8 sm:$0x7] %vm2532_vm1, %v85_v12 }
  0x66   :  { %v93_v13 = vpop.permute.xlu2 %92 }
  0x67   :  { %v94_v14 = vrot.slane %v93_v13, 1 }
  0x69   :  { %v96_v17 = vsel %vm95_vm2, %v93_v13, %v94_v14 }
  0x6a   :  { %99 = vst.msk [vmem:[#allocation2 + $0x6] ss:$8 sm:$0x7] %vm2532_vm1, %v96_v17 }
  0x6e   :  { %v148_v63 = vpop.permute.xlu2 %147 }
  0x74   :  { %v60_v20 = vpop.permute.xlu1 %59 }
  0x75   :  { %v38_v21 = vpop.permute.xlu0 %37  ;;  %v61_v22 = vrot.slane %v60_v20, 1 }
  0x76   :  { %v39_v23 = vrot.slane %v38_v21, 1 }
  0x77   :  { %v63_v24 = vsel %vm62_vm4, %v60_v20, %v61_v22 }
  0x78   :  { %v41_v25 = vsel %vm40_vm5, %v38_v21, %v39_v23  ;;  %66 = vst.msk [vmem:[#allocation2 + $0x3] ss:$8 sm:$0x7] %vm2532_vm1, %v63_v24 }
  0x79   :  { %44 = vst.msk [vmem:[#allocation2 + $0x1] ss:$8 sm:$0x7] %vm2532_vm1, %v41_v25 }
  0x7c   :  { %v71_v27 = vpop.permute.xlu1 %70 }
  0x7d   :  { %v49_v28 = vpop.permute.xlu0 %48  ;;  %v72_v29 = vrot.slane %v71_v27, 1 }
  0x7e   :  { %v50_v30 = vrot.slane %v49_v28, 1 }
  0x7f   :  { %v74_v32 = vsel %vm73_vm6, %v71_v27, %v72_v29 }
  0x80   :  { %v52_v33 = vsel %vm51_vm7, %v49_v28, %v50_v30  ;;  %77 = vst.msk [vmem:[#allocation2 + $0x4] ss:$8 sm:$0x7] %vm2532_vm1, %v74_v32 }
  0x81   :  { %55 = vst.msk [vmem:[#allocation2 + $0x2] ss:$8 sm:$0x7] %vm2532_vm1, %v52_v33 }
  0x84   :  { %v115_v34 = vpop.permute.xlu1 %114 }
  0x85   :  { %v104_v35 = vpop.permute.xlu0 %103  ;;  %v116_v36 = vrot.slane %v115_v34, 1 }
  0x86   :  { %v105_v37 = vrot.slane %v104_v35, 1 }
  0x87   :  { %v118_v38 = vsel %vm117_vm8, %v115_v34, %v116_v36 }
  0x88   :  { %v107_v39 = vsel %vm106_vm9, %v104_v35, %v105_v37  ;;  %121 = vst.msk [vmem:[#allocation2 + $0x18] ss:$8 sm:$0x7] %vm2532_vm1, %v118_v38 }
  0x89   :  { %110 = vst.msk [vmem:[#allocation2 + $0x7] ss:$8 sm:$0x7] %vm2532_vm1, %v107_v39 }
  0x8c   :  { %v2637_v59 = vpop.permute.xlu1 %157 }
  0x8d   :  { %v153_v19 = vpop.permute.xlu0 %152 }
  0x8f   :  { %v134_v41 = vld [vmem:[#allocation2 + $0x18] sm:$0xff]  ;;  %v136_v42 = vld [vmem:[#allocation2 + $0x28] sm:$0xff]  ;;  %v135_v47 = vld [vmem:[#allocation2 + $0x20] sm:$0xff] }
  0x90   :  { %224 = vmatpush.msra.mxu0 %v134_v41  ;;  %2394 = vmatpush.msra.mxu1 %v134_v41  ;;  %v131_v44 = vld [vmem:[#allocation2] sm:$0xff]  ;;  %v133_v46 = vld [vmem:[#allocation2 + $0x10] sm:$0xff]  ;;  %v132_v49 = vld [vmem:[#allocation2 + $0x8] sm:$0xff] }
  0x91   :  { %306 = vmatpush.msra.mxu2 %v136_v42  ;;  %v163_v42 = vpop.permute.xlu2 %162 }
  0x92   :  { %225 = vmatpush.msra.mxu0 %v131_v44  ;;  %2395 = vmatpush.msra.mxu1 %v131_v44 }
  0x93   :  { %307 = vmatpush.msra.mxu2 %v133_v46  ;;  %2364 = vmatmul.msk.f32.vlgmr.msra.gmra.mxu0 %vm185_vm10, %v123_v43 }
  0x94   :  { %2371 = vmatmul.msk.f32.vlgmr.msra.gmra.mxu1 %vm185_vm10, %v130_v45  ;;  %2380 = vmatmul.msk.f32.vlgmr.msra.gmra.mxu2 %vm185_vm10, %v123_v43  ;;  %v2639_v60 = vpop.permute.xlu1 %167 }
  0x95   :  { %265 = vmatpush.msrb.mxu1 %v135_v47 }
  0x97   :  { %266 = vmatpush.msrb.mxu1 %v132_v49 }
  0x9b   :  { %2365 = vmatmul.msk.f32.gmra.mxu0 %vm185_vm10, %v124_v50 }
  0x9c   :  { %2372 = vmatmul.msk.f32.vlgmr.msrb.gmra.mxu1 %vm185_vm10, %v123_v43  ;;  %2381 = vmatmul.msk.f32.gmra.mxu2 %vm185_vm10, %v124_v50  ;;  %v2644_v62 = vpop.permute.xlu1 %182 }
  0xa3   :  { %2366 = vmatmul.msk.f32.gmra.mxu0 %vm185_vm10, %v125_v52 }
  0xa4   :  { %2373 = vmatmul.msk.f32.gmra.mxu1 %vm185_vm10, %v124_v50  ;;  %2382 = vmatmul.msk.f32.gmra.mxu2 %vm185_vm10, %v125_v52 }
  0xab   :  { %2367 = vmatmul.msk.f32.gmra.mxu0 %vm185_vm10, %v126_v54 }
  0xac   :  { %2374 = vmatmul.msk.f32.gmra.mxu1 %vm185_vm10, %v125_v52  ;;  %2383 = vmatmul.msk.f32.gmra.mxu2 %vm185_vm10, %v126_v54 }
  0xb3   :  { %2368 = vmatmul.msk.f32.gmra.mxu0 %vm185_vm10, %v127_v56 }
  0xb4   :  { %2375 = vmatmul.msk.f32.gmra.mxu1 %vm185_vm10, %v126_v54  ;;  %2384 = vmatmul.msk.f32.gmra.mxu2 %vm185_vm10, %v127_v56 }
  0xbb   :  { %2369 = vmatmul.msk.f32.gmra.mxu0 %vm185_vm10, %v128_v57 }
  0xbc   :  { %2376 = vmatmul.msk.f32.gmra.mxu1 %vm185_vm10, %v127_v56  ;;  %2385 = vmatmul.msk.f32.gmra.mxu2 %vm185_vm10, %v128_v57 }
  0xc3   :  { %2370 = vmatmul.msk.f32.gmra.mxu0 %vm185_vm10, %v129_v58 }
  0xc4   :  { %2377 = vmatmul.msk.f32.gmra.mxu1 %vm185_vm10, %v128_v57  ;;  %2386 = vmatmul.msk.f32.gmra.mxu2 %vm185_vm10, %v129_v58 }
  0xcc   :  { %2378 = vmatmul.msk.f32.gmra.mxu1 %vm185_vm10, %v129_v58  ;;  %2387 = vmatmul.msk.f32.gmra.mxu2 %vm185_vm10, %v130_v45 }
  0xd4   :  { %2379 = vmatmul.msk.f32.gmra.mxu1 %vm185_vm10, %v130_v45 }
 0x110   :  { %v227_v0 = vpop.f32.mrf.mxu0 }
 0x111   :  { %v228_v1 = vadd.f32 %v227_v0, %v148_v63  ;;  %v248_v3 = vpop.f32.mrf.mxu1 }
 0x112   :  { %v249_v4 = vadd.f32 %v248_v3, %v2644_v62 }
 0x113   :  { %v333_v5 = vmax.f32 %v228_v1, 0.0 }
 0x114   :  { %v354_v6 = vmax.f32 %v249_v4, 0.0 }
 0x115   :  { %v2650_v7 = vmul.f32 %v2646_v2, %v333_v5 }
 0x116   :  { %v2653_v8 = vmul.f32 %v2646_v2, %v354_v6 }
 0x117   :  { %389 = vst [vmem:[#allocation3] sm:$0xff] %v2650_v7  ;;  %v309_v9 = vpop.f32.mrf.mxu2  ;;  %511 = vrot.lane.b32.xlu2 %v2650_v7, %s2453_s26 }
 0x118   :  { %411 = vst [vmem:[#allocation3 + $0xa8] sm:$0xff] %v2653_v8  ;;  %v310_v10 = vadd.f32 %v309_v9, %v148_v63  ;;  %v230_v12 = vpop.f32.mrf.mxu0 }
 0x119   :  { %v268_v13 = vpop.f32.mrf.mxu1  ;;  %v231_v21 = vadd.f32 %v230_v12, %v153_v19 }
 0x11a   :  { %v335_v14 = vmax.f32 %v310_v10, 0.0  ;;  %v269_v15 = vadd.f32 %v268_v13, %v148_v63 }
 0x11b   :  { %v336_v27 = vmax.f32 %v231_v21, 0.0 }
 0x11c   :  { %v367_v17 = vmul.f32 %v2659_v11, %v335_v14  ;;  %v334_v18 = vmax.f32 %v269_v15, 0.0  ;;  %v173_v15 = vpop.permute.xlu2 %172 }
 0x11d   :  { %v2678_v32 = vmul.f32 %v2646_v2, %v336_v27 }
 0x11e   :  { %392 = vst.msk [vmem:[#allocation3 + $0x10] sm:$0xff] %vm391_vm11, %v367_v17  ;;  %v2666_v20 = vmul.f32 %v2661_v16, %v334_v18  ;;  %v1423_v22 = vld [vmem:[#allocation3] sm:$0xff] }
 0x11f   :  { %v312_v23 = vpop.f32.mrf.mxu2  ;;  %553 = vrot.lane.b32.xlu2 %v2653_v8, %s2453_s26  ;;  %v2670_v24 = vld [vmem:[#allocation3 + $0xa8] sm:$0xff]  ;;  %438 = vst [vmem:[#allocation4] sm:$0xff] %v1423_v22 }
 0x120   :  { %390 = vst [vmem:[#allocation3 + $0x8] sm:$0xff] %v2666_v20  ;;  %v233_v25 = vpop.f32.mrf.mxu0  ;;  %513 = vrot.lane.b32.xlu0 %v2666_v20, %s2453_s26  ;;  %v313_v26 = vadd.f32 %v312_v23, %v153_v19 }
 0x121   :  { %v234_v28 = vadd.f32 %v233_v25, %v2637_v59  ;;  %v271_v29 = vpop.f32.mrf.mxu1  ;;  %460 = vst [vmem:[#allocation4 + $0xa8] sm:$0xff] %v2670_v24 }
 0x122   :  { %v272_v30 = vadd.f32 %v271_v29, %v153_v19  ;;  %v338_v31 = vmax.f32 %v313_v26, 0.0  ;;  %393 = vst [vmem:[#allocation3 + $0x18] sm:$0xff] %v2678_v32 }
 0x123   :  { %v339_v33 = vmax.f32 %v234_v28, 0.0 }
 0x124   :  { %v337_v34 = vmax.f32 %v272_v30, 0.0  ;;  %v370_v35 = vmul.f32 %v2659_v11, %v338_v31 }
 0x125   :  { %v2683_v36 = vmul.f32 %v2646_v2, %v339_v33  ;;  %v2685_v37 = vld [vmem:[#allocation3 + $0x10] sm:$0xff] }
 0x126   :  { %515 = vrot.lane.b32.xlu1 %v2685_v37, %s2453_s26  ;;  %v2690_v38 = vmul.f32 %v2661_v16, %v337_v34  ;;  %395 = vst.msk [vmem:[#allocation3 + $0x28] sm:$0xff] %vm391_vm11, %v370_v35  ;;  %v2698_v41 = vld [vmem:[#allocation3 + $0x10] sm:$0xff]  ;;  %v178_v35 = vpop.permute.xlu0 %177 }
 0x127   :  { %396 = vst [vmem:[#allocation3 + $0x30] sm:$0xff] %v2683_v36  ;;  %v315_v39 = vpop.f32.mrf.mxu2  ;;  %671 = vrot.lane.b32.xlu2 %v2650_v7, %s2456_s11  ;;  %v2696_v40 = vld [vmem:[#allocation3 + $0x8] sm:$0xff] }
 0x128   :  { %v316_v43 = vadd.f32 %v315_v39, %v2637_v59  ;;  %v236_v44 = vpop.f32.mrf.mxu0  ;;  %673 = vrot.lane.b32.xlu0 %v2666_v20, %s2456_s11  ;;  %394 = vst [vmem:[#allocation3 + $0x20] sm:$0xff] %v2690_v38 }
 0x129   :  { %v237_v45 = vadd.f32 %v236_v44, %v163_v42  ;;  %v274_v46 = vpop.f32.mrf.mxu1  ;;  %439 = vst [vmem:[#allocation4 + $0x8] sm:$0xff] %v2696_v40  ;;  %v417_v56 = vld [vmem:[#allocation3 + $0x18] sm:$0xff] }
 0x12a   :  { %v341_v47 = vmax.f32 %v316_v43, 0.0  ;;  %v275_v48 = vadd.f32 %v274_v46, %v2637_v59  ;;  %441 = vst.msk [vmem:[#allocation4 + $0x10] sm:$0xff] %vm440_vm12, %v2698_v41 }
 0x12b   :  { %v342_v49 = vmax.f32 %v237_v45, 0.0  ;;  %442 = vst [vmem:[#allocation4 + $0x18] sm:$0xff] %v417_v56 }
 0x12c   :  { %v373_v50 = vmul.f32 %v2659_v11, %v341_v47  ;;  %v340_v51 = vmax.f32 %v275_v48, 0.0 }
 0x12d   :  { %v2710_v52 = vmul.f32 %v2646_v2, %v342_v49  ;;  %v2730_v0 = vld [vmem:[#allocation3 + $0x28] sm:$0xff] }
 0x12e   :  { %398 = vst.msk [vmem:[#allocation3 + $0x40] sm:$0xff] %vm391_vm11, %v373_v50  ;;  %v2714_v53 = vmul.f32 %v2661_v16, %v340_v51  ;;  %675 = vrot.lane.b32.xlu1 %v2685_v37, %s2456_s11  ;;  %v2718_v54 = vld [vmem:[#allocation3 + $0x30] sm:$0xff] }
 0x12f   :  { %399 = vst [vmem:[#allocation3 + $0x48] sm:$0xff] %v2710_v52  ;;  %v318_v55 = vpop.f32.mrf.mxu2  ;;  %713 = vrot.lane.b32.xlu2 %v2653_v8, %s2456_s11  ;;  %v2726_v59 = vld [vmem:[#allocation3 + $0x20] sm:$0xff] }
 0x130   :  { %397 = vst [vmem:[#allocation3 + $0x38] sm:$0xff] %v2714_v53  ;;  %v319_v57 = vadd.f32 %v318_v55, %v163_v42  ;;  %v239_v58 = vpop.f32.mrf.mxu0  ;;  %833 = vrot.lane.b32.xlu0 %v2666_v20, %s2452_s25 }
 0x131   :  { %v240_v61 = vadd.f32 %v239_v58, %v2639_v60  ;;  %v277_v63 = vpop.f32.mrf.mxu1  ;;  %445 = vst [vmem:[#allocation4 + $0x30] sm:$0xff] %v2718_v54 }
 0x132   :  { %v344_v1 = vmax.f32 %v319_v57, 0.0  ;;  %v278_v3 = vadd.f32 %v277_v63, %v163_v42  ;;  %443 = vst [vmem:[#allocation4 + $0x20] sm:$0xff] %v2726_v59  ;;  %v468_v63 = vld [vmem:[#allocation3 + $0x28] sm:$0xff] }
 0x133   :  { %v345_v4 = vmax.f32 %v240_v61, 0.0  ;;  %444 = vst.msk [vmem:[#allocation4 + $0x28] sm:$0xff] %vm440_vm12, %v2730_v0 }
 0x134   :  { %v376_v5 = vmul.f32 %v2659_v11, %v344_v1  ;;  %v343_v6 = vmax.f32 %v278_v3, 0.0 }
 0x135   :  { %v2737_v9 = vmul.f32 %v2646_v2, %v345_v4  ;;  %v2756_v19 = vld [vmem:[#allocation3 + $0x40] sm:$0xff] }
 0x136   :  { %401 = vst.msk [vmem:[#allocation3 + $0x58] sm:$0xff] %vm391_vm11, %v376_v5  ;;  %v2741_v10 = vmul.f32 %v2661_v16, %v343_v6  ;;  %835 = vrot.lane.b32.xlu1 %v2685_v37, %s2452_s25  ;;  %v2745_v12 = vld [vmem:[#allocation3 + $0x48] sm:$0xff] }
 0x137   :  { %402 = vst [vmem:[#allocation3 + $0x60] sm:$0xff] %v2737_v9  ;;  %v321_v13 = vpop.f32.mrf.mxu2  ;;  %831 = vrot.lane.b32.xlu2 %v2650_v7, %s2452_s25  ;;  %v2750_v14 = vld [vmem:[#allocation3 + $0x38] sm:$0xff] }
 0x138   :  { %400 = vst [vmem:[#allocation3 + $0x50] sm:$0xff] %v2741_v10  ;;  %v322_v17 = vadd.f32 %v321_v13, %v2639_v60  ;;  %v242_v18 = vpop.f32.mrf.mxu0  ;;  %993 = vrot.lane.b32.xlu0 %v2666_v20, %s2455_s10 }
 0x139   :  { %v243_v21 = vadd.f32 %v242_v18, %v173_v15  ;;  %v280_v22 = vpop.f32.mrf.mxu1  ;;  %448 = vst [vmem:[#allocation4 + $0x48] sm:$0xff] %v2745_v12 }
 0x13a   :  { %v347_v23 = vmax.f32 %v322_v17, 0.0  ;;  %v281_v25 = vadd.f32 %v280_v22, %v2639_v60  ;;  %446 = vst [vmem:[#allocation4 + $0x38] sm:$0xff] %v2750_v14 }
 0x13b   :  { %v348_v26 = vmax.f32 %v243_v21, 0.0  ;;  %447 = vst.msk [vmem:[#allocation4 + $0x40] sm:$0xff] %vm440_vm12, %v2756_v19 }
 0x13c   :  { %v379_v27 = vmul.f32 %v2659_v11, %v347_v23  ;;  %v346_v28 = vmax.f32 %v281_v25, 0.0 }
 0x13d   :  { %v2765_v29 = vmul.f32 %v2646_v2, %v348_v26  ;;  %v2783_v42 = vld [vmem:[#allocation3 + $0x58] sm:$0xff] }
 0x13e   :  { %404 = vst.msk [vmem:[#allocation3 + $0x70] sm:$0xff] %vm391_vm11, %v379_v27  ;;  %v2769_v30 = vmul.f32 %v2661_v16, %v346_v28  ;;  %995 = vrot.lane.b32.xlu1 %v2685_v37, %s2455_s10  ;;  %v2773_v60 = vld [vmem:[#allocation3 + $0x60] sm:$0xff] }
 0x13f   :  { %405 = vst [vmem:[#allocation3 + $0x78] sm:$0xff] %v2765_v29  ;;  %v324_v31 = vpop.f32.mrf.mxu2  ;;  %873 = vrot.lane.b32.xlu2 %v2653_v8, %s2452_s25  ;;  %v2778_v33 = vld [vmem:[#allocation3 + $0x50] sm:$0xff] }
 0x140   :  { %403 = vst [vmem:[#allocation3 + $0x68] sm:$0xff] %v2769_v30  ;;  %v325_v34 = vadd.f32 %v324_v31, %v173_v15  ;;  %v245_v39 = vpop.f32.mrf.mxu0  ;;  %1153 = vrot.lane.b32.xlu0 %v2666_v20, %s2454_s29 }
 0x141   :  { %v246_v43 = vadd.f32 %v245_v39, %v178_v35  ;;  %v283_v44 = vpop.f32.mrf.mxu1  ;;  %451 = vst [vmem:[#allocation4 + $0x60] sm:$0xff] %v2773_v60 }
 0x142   :  { %v350_v45 = vmax.f32 %v325_v34, 0.0  ;;  %v284_v46 = vadd.f32 %v283_v44, %v173_v15  ;;  %449 = vst [vmem:[#allocation4 + $0x50] sm:$0xff] %v2778_v33 }
 0x143   :  { %v351_v47 = vmax.f32 %v246_v43, 0.0  ;;  %450 = vst.msk [vmem:[#allocation4 + $0x58] sm:$0xff] %vm440_vm12, %v2783_v42 }
 0x144   :  { %v382_v48 = vmul.f32 %v2659_v11, %v350_v45  ;;  %v349_v49 = vmax.f32 %v284_v46, 0.0 }
 0x145   :  { %v2791_v50 = vmul.f32 %v2646_v2, %v351_v47  ;;  %v2809_v57 = vld [vmem:[#allocation3 + $0x70] sm:$0xff] }
 0x146   :  { %407 = vst.msk [vmem:[#allocation3 + $0x88] sm:$0xff] %vm391_vm11, %v382_v48  ;;  %v2795_v20 = vmul.f32 %v2661_v16, %v349_v49  ;;  %1155 = vrot.lane.b32.xlu1 %v2685_v37, %s2454_s29  ;;  %v2799_v51 = vld [vmem:[#allocation3 + $0x78] sm:$0xff] }
 0x147   :  { %408 = vst [vmem:[#allocation3 + $0x90] sm:$0xff] %v2791_v50  ;;  %v327_v55 = vpop.f32.mrf.mxu2  ;;  %991 = vrot.lane.b32.xlu2 %v2650_v7, %s2455_s10  ;;  %v2804_v56 = vld [vmem:[#allocation3 + $0x68] sm:$0xff]  ;;  %v2910_v48 = vld [vmem:[#allocation3 + $0x58] sm:$0xff] }
 0x148   :  { %406 = vst [vmem:[#allocation3 + $0x80] sm:$0xff] %v2795_v20  ;;  %v328_v2 = vadd.f32 %v327_v55, %v178_v35  ;;  %519 = vrot.lane.b32.xlu0 %v2690_v38, %s2453_s26 }
 0x149   :  { %3780 = vst [vmem:[#allocation8_spill] sm:$0xff] %v2809_v57  ;;  %v286_v58 = vpop.f32.mrf.mxu1 }
 0x14a   :  { %v353_v37 = vmax.f32 %v328_v2, 0.0  ;;  %v287_v61 = vadd.f32 %v286_v58, %v178_v35  ;;  %452 = vst [vmem:[#allocation4 + $0x68] sm:$0xff] %v2804_v56 }
 0x14b   :  { %453 = vst.msk [vmem:[#allocation4 + $0x70] sm:$0xff] %vm440_vm12, %v2809_v57 }
 0x14c   :  { %v385_v1 = vmul.f32 %v2659_v11, %v353_v37  ;;  %v352_v3 = vmax.f32 %v287_v61, 0.0 }
 0x14d   :  { %v2826_v15 = vld [vmem:[#allocation3 + $0x88] sm:$0xff] }
 0x14e   :  { %410 = vst.msk [vmem:[#allocation3 + $0xa0] sm:$0xff] %vm391_vm11, %v385_v1  ;;  %v2817_v4 = vmul.f32 %v2661_v16, %v352_v3  ;;  %521 = vrot.lane.b32.xlu1 %v468_v63, %s2453_s26  ;;  %v2820_v5 = vld [vmem:[#allocation3 + $0x90] sm:$0xff] }
 0x14f   :  { %v330_v6 = vpop.f32.mrf.mxu2  ;;  %1033 = vrot.lane.b32.xlu2 %v2653_v8, %s2455_s10  ;;  %v2824_v13 = vld [vmem:[#allocation3 + $0x80] sm:$0xff]  ;;  %3781 = vst [vmem:[#allocation9_spill] sm:$0xff] %v2826_v15 }
 0x150   :  { %409 = vst [vmem:[#allocation3 + $0x98] sm:$0xff] %v2817_v4  ;;  %v331_v17 = vadd.f32 %v330_v6, %v2644_v62  ;;  %679 = vrot.lane.b32.xlu0 %v2690_v38, %s2456_s11 }
 0x151   :  { %v289_v18 = vpop.f32.mrf.mxu1  ;;  %455 = vst [vmem:[#allocation4 + $0x80] sm:$0xff] %v2824_v13 }
 0x152   :  { %v356_v21 = vmax.f32 %v331_v17, 0.0  ;;  %v290_v22 = vadd.f32 %v289_v18, %v2644_v62  ;;  %456 = vst.msk [vmem:[#allocation4 + $0x88] sm:$0xff] %vm440_vm12, %v2826_v15 }
 0x154   :  { %v388_v23 = vmul.f32 %v2659_v11, %v356_v21  ;;  %v355_v25 = vmax.f32 %v290_v22, 0.0 }
 0x155   :  { %v2837_v26 = vld [vmem:[#allocation3 + $0xa0] sm:$0xff] }
 0x156   :  { %413 = vst.msk [vmem:[#allocation3 + $0xb8] sm:$0xff] %vm391_vm11, %v388_v23  ;;  %v2841_v27 = vmul.f32 %v2661_v16, %v355_v25  ;;  %681 = vrot.lane.b32.xlu1 %v468_v63, %s2456_s11  ;;  %v471_v16 = vld [vmem:[#allocation3 + $0x40] sm:$0xff] }
 0x157   :  { %1151 = vrot.lane.b32.xlu2 %v2650_v7, %s2454_s29  ;;  %v2846_v28 = vld [vmem:[#allocation3 + $0x98] sm:$0xff]  ;;  %459 = vst.msk [vmem:[#allocation4 + $0xa0] sm:$0xff] %vm440_vm12, %v2837_v26 }
 0x158   :  { %412 = vst [vmem:[#allocation3 + $0xb0] sm:$0xff] %v2841_v27  ;;  %839 = vrot.lane.b32.xlu0 %v2690_v38, %s2452_s25 }
 0x159   :  { %458 = vst [vmem:[#allocation4 + $0x98] sm:$0xff] %v2846_v28 }
 0x15d   :  { %v2854_v62 = vld [vmem:[#allocation3 + $0xb8] sm:$0xff] }
 0x15e   :  { %3782 = vst [vmem:[#allocation10_spill] sm:$0xff] %v2854_v62  ;;  %841 = vrot.lane.b32.xlu1 %v468_v63, %s2452_s25 }
 0x15f   :  { %462 = vst.msk [vmem:[#allocation4 + $0xb8] sm:$0xff] %vm440_vm12, %v2854_v62  ;;  %517 = vrot.lane.b32.xlu2 %v2678_v32, %s2453_s26  ;;  %v436_v7 = vld [vmem:[#allocation3 + $0xb0] sm:$0xff] }
 0x160   :  { %999 = vrot.lane.b32.xlu0 %v2690_v38, %s2455_s10  ;;  %461 = vst [vmem:[#allocation4 + $0xb0] sm:$0xff] %v436_v7 }
 0x166   :  { %1001 = vrot.lane.b32.xlu1 %v468_v63, %s2455_s10 }
 0x167   :  { %677 = vrot.lane.b32.xlu2 %v2678_v32, %s2456_s11 }
 0x168   :  { %1159 = vrot.lane.b32.xlu0 %v2690_v38, %s2454_s29 }
 0x16e   :  { %1161 = vrot.lane.b32.xlu1 %v468_v63, %s2454_s29 }
 0x16f   :  { %837 = vrot.lane.b32.xlu2 %v2678_v32, %s2452_s25 }
 0x170   :  { %525 = vrot.lane.b32.xlu0 %v2714_v53, %s2453_s26 }
 0x171   :  { %v512_v11 = vpop.permute.xlu2 %511 }
 0x176   :  { %527 = vrot.lane.b32.xlu1 %v471_v16, %s2453_s26 }
 0x177   :  { %997 = vrot.lane.b32.xlu2 %v2678_v32, %s2455_s10 }
 0x178   :  { %685 = vrot.lane.b32.xlu0 %v2714_v53, %s2456_s11 }
 0x179   :  { %v2878_v31 = vpop.permute.xlu2 %553 }
 0x17e   :  { %687 = vrot.lane.b32.xlu1 %v471_v16, %s2456_s11 }
 0x17f   :  { %1157 = vrot.lane.b32.xlu2 %v2678_v32, %s2454_s29 }
 0x180   :  { %845 = vrot.lane.b32.xlu0 %v2714_v53, %s2452_s25 }
 0x181   :  { %v672_v38 = vpop.permute.xlu2 %671 }
 0x186   :  { %847 = vrot.lane.b32.xlu1 %v471_v16, %s2452_s25 }
 0x187   :  { %523 = vrot.lane.b32.xlu2 %v2683_v36, %s2453_s26 }
 0x188   :  { %1005 = vrot.lane.b32.xlu0 %v2714_v53, %s2455_s10 }
 0x189   :  { %v2890_v34 = vpop.permute.xlu2 %713 }
 0x18e   :  { %1007 = vrot.lane.b32.xlu1 %v471_v16, %s2455_s10 }
 0x18f   :  { %683 = vrot.lane.b32.xlu2 %v2683_v36, %s2456_s11 }
 0x190   :  { %1165 = vrot.lane.b32.xlu0 %v2714_v53, %s2454_s29 }
 0x191   :  { %v832_v35 = vpop.permute.xlu2 %831 }
 0x192   :  { %v514_v39 = vpop.permute.xlu0 %513 }
 0x193   :  { %v2898_v43 = vsel %vm40_vm5, %v512_v11, %v514_v39 }
 0x196   :  { %1167 = vrot.lane.b32.xlu1 %v471_v16, %s2454_s29 }
 0x197   :  { %843 = vrot.lane.b32.xlu2 %v2683_v36, %s2452_s25 }
 0x198   :  { %v516_v44 = vpop.permute.xlu1 %515  ;;  %531 = vrot.lane.b32.xlu0 %v2741_v10, %s2453_s26 }
 0x199   :  { %601 = vst.msk [vmem:[#allocation4 + $0xd0] sm:$0xff] %vm440_vm12, %v516_v44  ;;  %v560_v45 = vsel %vm40_vm5, %v514_v39, %v516_v44  ;;  %v2907_v46 = vpop.permute.xlu2 %873 }
 0x19a   :  { %600 = vst [vmem:[#allocation4 + $0xc8] sm:$0xff] %v560_v45  ;;  %v674_v53 = vpop.permute.xlu0 %673 }
 0x19b   :  { %v719_v47 = vsel %vm51_vm7, %v672_v38, %v674_v53  ;;  %v2952_v38 = vld [vmem:[#allocation3 + $0x70] sm:$0xff] }
 0x19c   :  { %759 = vst [vmem:[#allocation4 + $0x180] sm:$0xff] %v719_v47 }
 0x19e   :  { %533 = vrot.lane.b32.xlu1 %v2910_v48, %s2453_s26 }
 0x19f   :  { %1003 = vrot.lane.b32.xlu2 %v2683_v36, %s2455_s10 }
 0x1a0   :  { %v676_v49 = vpop.permute.xlu1 %675  ;;  %691 = vrot.lane.b32.xlu0 %v2741_v10, %s2456_s11 }
 0x1a1   :  { %761 = vst.msk [vmem:[#allocation4 + $0x190] sm:$0xff] %vm440_vm12, %v676_v49  ;;  %v720_v55 = vsel %vm51_vm7, %v674_v53, %v676_v49  ;;  %v992_v2 = vpop.permute.xlu2 %991 }
 0x1a2   :  { %760 = vst [vmem:[#allocation4 + $0x188] sm:$0xff] %v720_v55  ;;  %v834_v58 = vpop.permute.xlu0 %833 }
 0x1a3   :  { %v879_v37 = vsel %vm62_vm4, %v832_v35, %v834_v58 }
 0x1a4   :  { %919 = vst [vmem:[#allocation4 + $0x240] sm:$0xff] %v879_v37 }
 0x1a6   :  { %693 = vrot.lane.b32.xlu1 %v2910_v48, %s2456_s11 }
 0x1a7   :  { %1163 = vrot.lane.b32.xlu2 %v2683_v36, %s2454_s29 }
 0x1a8   :  { %v836_v61 = vpop.permute.xlu1 %835  ;;  %851 = vrot.lane.b32.xlu0 %v2741_v10, %s2452_s25 }
 0x1a9   :  { %921 = vst.msk [vmem:[#allocation4 + $0x250] sm:$0xff] %vm440_vm12, %v836_v61  ;;  %v880_v63 = vsel %vm62_vm4, %v834_v58, %v836_v61  ;;  %v2929_v1 = vpop.permute.xlu2 %1033 }
 0x1aa   :  { %920 = vst [vmem:[#allocation4 + $0x248] sm:$0xff] %v880_v63  ;;  %v994_v3 = vpop.permute.xlu0 %993 }
 0x1ab   :  { %v1039_v6 = vsel %vm73_vm6, %v992_v2, %v994_v3 }
 0x1ac   :  { %1079 = vst [vmem:[#allocation4 + $0x300] sm:$0xff] %v1039_v6 }
 0x1ae   :  { %853 = vrot.lane.b32.xlu1 %v2910_v48, %s2452_s25 }
 0x1af   :  { %529 = vrot.lane.b32.xlu2 %v2710_v52, %s2453_s26 }
 0x1b0   :  { %v996_v36 = vpop.permute.xlu1 %995  ;;  %1011 = vrot.lane.b32.xlu0 %v2741_v10, %s2455_s10 }
 0x1b1   :  { %1081 = vst.msk [vmem:[#allocation4 + $0x310] sm:$0xff] %vm440_vm12, %v996_v36  ;;  %v1040_v17 = vsel %vm73_vm6, %v994_v3, %v996_v36  ;;  %v1152_v18 = vpop.permute.xlu2 %1151 }
 0x1b2   :  { %1080 = vst [vmem:[#allocation4 + $0x308] sm:$0xff] %v1040_v17  ;;  %v1154_v21 = vpop.permute.xlu0 %1153 }
 0x1b3   :  { %v1199_v22 = vsel %vm84_vm0, %v1152_v18, %v1154_v21 }
 0x1b4   :  { %1239 = vst [vmem:[#allocation4 + $0x3c0] sm:$0xff] %v1199_v22 }
 0x1b6   :  { %1013 = vrot.lane.b32.xlu1 %v2910_v48, %s2455_s10 }
 0x1b7   :  { %689 = vrot.lane.b32.xlu2 %v2710_v52, %s2456_s11 }
 0x1b8   :  { %v1156_v23 = vpop.permute.xlu1 %1155  ;;  %537 = vrot.lane.b32.xlu0 %v2769_v30, %s2453_s26 }
 0x1b9   :  { %1241 = vst.msk [vmem:[#allocation4 + $0x3d0] sm:$0xff] %vm440_vm12, %v1156_v23  ;;  %v1200_v25 = vsel %vm84_vm0, %v1154_v21, %v1156_v23  ;;  %v518_v7 = vpop.permute.xlu2 %517  ;;  %v2994_v23 = vld [vmem:[#allocation3 + $0x88] sm:$0xff] }
 0x1ba   :  { %1240 = vst [vmem:[#allocation4 + $0x3c8] sm:$0xff] %v1200_v25  ;;  %v520_v11 = vpop.permute.xlu0 %519 }
 0x1bb   :  { %v2950_v16 = vsel %vm40_vm5, %v518_v7, %v520_v11 }
 0x1be   :  { %539 = vrot.lane.b32.xlu1 %v2952_v38, %s2453_s26 }
 0x1bf   :  { %849 = vrot.lane.b32.xlu2 %v2710_v52, %s2452_s25 }
 0x1c0   :  { %v522_v35 = vpop.permute.xlu1 %521  ;;  %697 = vrot.lane.b32.xlu0 %v2769_v30, %s2456_s11 }
 0x1c1   :  { %604 = vst.msk [vmem:[#allocation4 + $0xe8] sm:$0xff] %vm440_vm12, %v522_v35  ;;  %v562_v39 = vsel %vm40_vm5, %v520_v11, %v522_v35  ;;  %v678_v44 = vpop.permute.xlu2 %677 }
 0x1c2   :  { %603 = vst [vmem:[#allocation4 + $0xe0] sm:$0xff] %v562_v39  ;;  %v680_v45 = vpop.permute.xlu0 %679 }
 0x1c3   :  { %v721_v53 = vsel %vm51_vm7, %v678_v44, %v680_v45 }
 0x1c4   :  { %762 = vst [vmem:[#allocation4 + $0x198] sm:$0xff] %v721_v53 }
 0x1c6   :  { %699 = vrot.lane.b32.xlu1 %v2952_v38, %s2456_s11 }
 0x1c7   :  { %1009 = vrot.lane.b32.xlu2 %v2710_v52, %s2455_s10 }
 0x1c8   :  { %v682_v47 = vpop.permute.xlu1 %681  ;;  %857 = vrot.lane.b32.xlu0 %v2769_v30, %s2452_s25 }
 0x1c9   :  { %764 = vst.msk [vmem:[#allocation4 + $0x1a8] sm:$0xff] %vm440_vm12, %v682_v47  ;;  %v722_v49 = vsel %vm51_vm7, %v680_v45, %v682_v47  ;;  %v838_v55 = vpop.permute.xlu2 %837 }
 0x1ca   :  { %763 = vst [vmem:[#allocation4 + $0x1a0] sm:$0xff] %v722_v49  ;;  %v840_v2 = vpop.permute.xlu0 %839 }
 0x1cb   :  { %v2972_v58 = vsel %vm62_vm4, %v838_v55, %v840_v2 }
 0x1ce   :  { %859 = vrot.lane.b32.xlu1 %v2952_v38, %s2452_s25 }
 0x1cf   :  { %535 = vrot.lane.b32.xlu2 %v2737_v9, %s2453_s26 }
 0x1d0   :  { %v842_v37 = vpop.permute.xlu1 %841  ;;  %1017 = vrot.lane.b32.xlu0 %v2769_v30, %s2455_s10 }
 0x1d1   :  { %924 = vst.msk [vmem:[#allocation4 + $0x268] sm:$0xff] %vm440_vm12, %v842_v37  ;;  %v882_v61 = vsel %vm62_vm4, %v840_v2, %v842_v37  ;;  %v998_v63 = vpop.permute.xlu2 %997 }
 0x1d2   :  { %923 = vst [vmem:[#allocation4 + $0x260] sm:$0xff] %v882_v61  ;;  %v1000_v3 = vpop.permute.xlu0 %999 }
 0x1d3   :  { %v1041_v6 = vsel %vm73_vm6, %v998_v63, %v1000_v3 }
 0x1d4   :  { %1082 = vst [vmem:[#allocation4 + $0x318] sm:$0xff] %v1041_v6 }
 0x1d6   :  { %1019 = vrot.lane.b32.xlu1 %v2952_v38, %s2455_s10 }
 0x1d7   :  { %695 = vrot.lane.b32.xlu2 %v2737_v9, %s2456_s11 }
 0x1d8   :  { %v1002_v36 = vpop.permute.xlu1 %1001  ;;  %543 = vrot.lane.b32.xlu0 %v2795_v20, %s2453_s26 }
 0x1d9   :  { %1084 = vst.msk [vmem:[#allocation4 + $0x328] sm:$0xff] %vm440_vm12, %v1002_v36  ;;  %v1042_v17 = vsel %vm73_vm6, %v1000_v3, %v1002_v36  ;;  %v1158_v18 = vpop.permute.xlu2 %1157 }
 0x1da   :  { %1083 = vst [vmem:[#allocation4 + $0x320] sm:$0xff] %v1042_v17  ;;  %v1160_v21 = vpop.permute.xlu0 %1159 }
 0x1db   :  { %v2992_v22 = vsel %vm84_vm0, %v1158_v18, %v1160_v21 }
 0x1de   :  { %545 = vrot.lane.b32.xlu1 %v2994_v23, %s2453_s26 }
 0x1df   :  { %855 = vrot.lane.b32.xlu2 %v2737_v9, %s2452_s25 }
 0x1e0   :  { %v1162_v25 = vpop.permute.xlu1 %1161  ;;  %703 = vrot.lane.b32.xlu0 %v2795_v20, %s2456_s11 }
 0x1e1   :  { %1244 = vst.msk [vmem:[#allocation4 + $0x3e8] sm:$0xff] %vm440_vm12, %v1162_v25  ;;  %v1202_v7 = vsel %vm84_vm0, %v1160_v21, %v1162_v25  ;;  %v524_v11 = vpop.permute.xlu2 %523 }
 0x1e2   :  { %1243 = vst [vmem:[#allocation4 + $0x3e0] sm:$0xff] %v1202_v7  ;;  %v526_v35 = vpop.permute.xlu0 %525 }
 0x1e3   :  { %v3005_v39 = vsel %vm40_vm5, %v524_v11, %v526_v35 }
 0x1e6   :  { %705 = vrot.lane.b32.xlu1 %v2994_v23, %s2456_s11 }
 0x1e7   :  { %1015 = vrot.lane.b32.xlu2 %v2737_v9, %s2455_s10 }
 0x1e8   :  { %v528_v44 = vpop.permute.xlu1 %527  ;;  %863 = vrot.lane.b32.xlu0 %v2795_v20, %s2452_s25 }
 0x1e9   :  { %607 = vst.msk [vmem:[#allocation4 + $0x100] sm:$0xff] %vm440_vm12, %v528_v44  ;;  %v564_v45 = vsel %vm40_vm5, %v526_v35, %v528_v44  ;;  %v684_v53 = vpop.permute.xlu2 %683  ;;  %v3049_v35 = vld [vmem:[#allocation3 + $0xa0] sm:$0xff] }
 0x1ea   :  { %606 = vst [vmem:[#allocation4 + $0xf8] sm:$0xff] %v564_v45  ;;  %v686_v47 = vpop.permute.xlu0 %685 }
 0x1eb   :  { %v3016_v49 = vsel %vm51_vm7, %v684_v53, %v686_v47 }
 0x1ee   :  { %865 = vrot.lane.b32.xlu1 %v2994_v23, %s2452_s25 }
 0x1ef   :  { %541 = vrot.lane.b32.xlu2 %v2765_v29, %s2453_s26 }
 0x1f0   :  { %v688_v55 = vpop.permute.xlu1 %687  ;;  %1023 = vrot.lane.b32.xlu0 %v2795_v20, %s2455_s10 }
 0x1f1   :  { %767 = vst.msk [vmem:[#allocation4 + $0x1c0] sm:$0xff] %vm440_vm12, %v688_v55  ;;  %v724_v2 = vsel %vm51_vm7, %v686_v47, %v688_v55  ;;  %v844_v37 = vpop.permute.xlu2 %843 }
 0x1f2   :  { %766 = vst [vmem:[#allocation4 + $0x1b8] sm:$0xff] %v724_v2  ;;  %v846_v61 = vpop.permute.xlu0 %845 }
 0x1f3   :  { %v3027_v63 = vsel %vm62_vm4, %v844_v37, %v846_v61 }
 0x1f6   :  { %1025 = vrot.lane.b32.xlu1 %v2994_v23, %s2455_s10 }
 0x1f7   :  { %701 = vrot.lane.b32.xlu2 %v2765_v29, %s2456_s11 }
 0x1f8   :  { %v848_v3 = vpop.permute.xlu1 %847  ;;  %1171 = vrot.lane.b32.xlu0 %v2741_v10, %s2454_s29 }
 0x1f9   :  { %927 = vst.msk [vmem:[#allocation4 + $0x280] sm:$0xff] %vm440_vm12, %v848_v3  ;;  %v884_v6 = vsel %vm62_vm4, %v846_v61, %v848_v3  ;;  %v1004_v36 = vpop.permute.xlu2 %1003 }
 0x1fa   :  { %926 = vst [vmem:[#allocation4 + $0x278] sm:$0xff] %v884_v6  ;;  %v1006_v17 = vpop.permute.xlu0 %1005 }
 0x1fb   :  { %v1043_v18 = vsel %vm73_vm6, %v1004_v36, %v1006_v17 }
 0x1fc   :  { %1085 = vst [vmem:[#allocation4 + $0x330] sm:$0xff] %v1043_v18 }
 0x1fe   :  { %1173 = vrot.lane.b32.xlu1 %v2910_v48, %s2454_s29 }
 0x1ff   :  { %861 = vrot.lane.b32.xlu2 %v2765_v29, %s2452_s25 }
 0x200   :  { %v1008_v21 = vpop.permute.xlu1 %1007  ;;  %549 = vrot.lane.b32.xlu0 %v2817_v4, %s2453_s26 }
 0x201   :  { %1087 = vst.msk [vmem:[#allocation4 + $0x340] sm:$0xff] %vm440_vm12, %v1008_v21  ;;  %v1044_v10 = vsel %vm73_vm6, %v1006_v17, %v1008_v21  ;;  %v1164_v25 = vpop.permute.xlu2 %1163 }
 0x202   :  { %1086 = vst [vmem:[#allocation4 + $0x338] sm:$0xff] %v1044_v10  ;;  %v1166_v7 = vpop.permute.xlu0 %1165 }
 0x203   :  { %v3047_v11 = vsel %vm84_vm0, %v1164_v25, %v1166_v7 }
 0x206   :  { %551 = vrot.lane.b32.xlu1 %v3049_v35, %s2453_s26 }
 0x207   :  { %1021 = vrot.lane.b32.xlu2 %v2765_v29, %s2455_s10 }
 0x208   :  { %v1168_v48 = vpop.permute.xlu1 %1167  ;;  %709 = vrot.lane.b32.xlu0 %v2817_v4, %s2456_s11 }
 0x209   :  { %1247 = vst.msk [vmem:[#allocation4 + $0x400] sm:$0xff] %vm440_vm12, %v1168_v48  ;;  %v1204_v44 = vsel %vm84_vm0, %v1166_v7, %v1168_v48  ;;  %v530_v45 = vpop.permute.xlu2 %529 }
 0x20a   :  { %1246 = vst [vmem:[#allocation4 + $0x3f8] sm:$0xff] %v1204_v44  ;;  %v532_v53 = vpop.permute.xlu0 %531 }
 0x20b   :  { %v3060_v47 = vsel %vm40_vm5, %v530_v45, %v532_v53  ;;  %v3097_v45 = vld [vmem:[#allocation3 + $0xb8] sm:$0xff] }
 0x20e   :  { %711 = vrot.lane.b32.xlu1 %v3049_v35, %s2456_s11 }
 0x20f   :  { %547 = vrot.lane.b32.xlu2 %v2791_v50, %s2453_s26 }
 0x210   :  { %v534_v55 = vpop.permute.xlu1 %533  ;;  %869 = vrot.lane.b32.xlu0 %v2817_v4, %s2452_s25 }
 0x211   :  { %610 = vst.msk [vmem:[#allocation4 + $0x118] sm:$0xff] %vm440_vm12, %v534_v55  ;;  %v3070_v2 = vsel %vm40_vm5, %v532_v53, %v534_v55  ;;  %v690_v37 = vpop.permute.xlu2 %689 }
 0x212   :  { %v692_v61 = vpop.permute.xlu0 %691 }
 0x213   :  { %v3073_v3 = vsel %vm51_vm7, %v690_v37, %v692_v61 }
 0x216   :  { %871 = vrot.lane.b32.xlu1 %v3049_v35, %s2452_s25 }
 0x217   :  { %707 = vrot.lane.b32.xlu2 %v2791_v50, %s2456_s11 }
 0x218   :  { %v694_v6 = vpop.permute.xlu1 %693  ;;  %1029 = vrot.lane.b32.xlu0 %v2817_v4, %s2455_s10 }
 0x219   :  { %770 = vst.msk [vmem:[#allocation4 + $0x1d8] sm:$0xff] %vm440_vm12, %v694_v6  ;;  %v726_v36 = vsel %vm51_vm7, %v692_v61, %v694_v6  ;;  %v850_v17 = vpop.permute.xlu2 %849 }
 0x21a   :  { %769 = vst [vmem:[#allocation4 + $0x1d0] sm:$0xff] %v726_v36  ;;  %v852_v18 = vpop.permute.xlu0 %851 }
 0x21b   :  { %v3084_v21 = vsel %vm62_vm4, %v850_v17, %v852_v18 }
 0x21e   :  { %1031 = vrot.lane.b32.xlu1 %v3049_v35, %s2455_s10 }
 0x21f   :  { %867 = vrot.lane.b32.xlu2 %v2791_v50, %s2452_s25 }
 0x220   :  { %v854_v10 = vpop.permute.xlu1 %853  ;;  %555 = vrot.lane.b32.xlu0 %v2841_v27, %s2453_s26 }
 0x221   :  { %930 = vst.msk [vmem:[#allocation4 + $0x298] sm:$0xff] %vm440_vm12, %v854_v10  ;;  %v886_v25 = vsel %vm62_vm4, %v852_v18, %v854_v10  ;;  %v1010_v7 = vpop.permute.xlu2 %1009 }
 0x222   :  { %929 = vst [vmem:[#allocation4 + $0x290] sm:$0xff] %v886_v25  ;;  %v1012_v48 = vpop.permute.xlu0 %1011 }
 0x223   :  { %v3095_v44 = vsel %vm73_vm6, %v1010_v7, %v1012_v48 }
 0x226   :  { %557 = vrot.lane.b32.xlu1 %v3097_v45, %s2453_s26 }
 0x227   :  { %1027 = vrot.lane.b32.xlu2 %v2791_v50, %s2455_s10 }
 0x228   :  { %v1014_v53 = vpop.permute.xlu1 %1013  ;;  %715 = vrot.lane.b32.xlu0 %v2841_v27, %s2456_s11 }
 0x229   :  { %1090 = vst.msk [vmem:[#allocation4 + $0x358] sm:$0xff] %vm440_vm12, %v1014_v53  ;;  %v1046_v55 = vsel %vm73_vm6, %v1012_v48, %v1014_v53  ;;  %v536_v37 = vpop.permute.xlu2 %535 }
 0x22a   :  { %1089 = vst [vmem:[#allocation4 + $0x350] sm:$0xff] %v1046_v55  ;;  %v538_v61 = vpop.permute.xlu0 %537 }
 0x22b   :  { %v3108_v6 = vsel %vm40_vm5, %v536_v37, %v538_v61 }
 0x22e   :  { %717 = vrot.lane.b32.xlu1 %v3097_v45, %s2456_s11 }
 0x22f   :  { %1169 = vrot.lane.b32.xlu2 %v2710_v52, %s2454_s29 }
 0x230   :  { %v540_v36 = vpop.permute.xlu1 %539  ;;  %875 = vrot.lane.b32.xlu0 %v2841_v27, %s2452_s25 }
 0x231   :  { %613 = vst.msk [vmem:[#allocation4 + $0x130] sm:$0xff] %vm440_vm12, %v540_v36  ;;  %v3118_v17 = vsel %vm40_vm5, %v538_v61, %v540_v36  ;;  %v696_v18 = vpop.permute.xlu2 %695 }
 0x232   :  { %v698_v10 = vpop.permute.xlu0 %697 }
 0x233   :  { %v3121_v25 = vsel %vm51_vm7, %v696_v18, %v698_v10 }
 0x236   :  { %877 = vrot.lane.b32.xlu1 %v3097_v45, %s2452_s25 }
 0x237   :  { %1193 = vrot.lane.b32.xlu2 %v2653_v8, %s2454_s29 }
 0x238   :  { %v700_v52 = vpop.permute.xlu1 %699  ;;  %1035 = vrot.lane.b32.xlu0 %v2841_v27, %s2455_s10 }
 0x239   :  { %773 = vst.msk [vmem:[#allocation4 + $0x1f0] sm:$0xff] %vm440_vm12, %v700_v52  ;;  %v728_v7 = vsel %vm51_vm7, %v698_v10, %v700_v52  ;;  %v856_v48 = vpop.permute.xlu2 %855 }
 0x23a   :  { %772 = vst [vmem:[#allocation4 + $0x1e8] sm:$0xff] %v728_v7  ;;  %v858_v53 = vpop.permute.xlu0 %857 }
 0x23b   :  { %v3132_v55 = vsel %vm62_vm4, %v856_v48, %v858_v53 }
 0x23e   :  { %1037 = vrot.lane.b32.xlu1 %v3097_v45, %s2455_s10 }
 0x23f   :  { %1189 = vrot.lane.b32.xlu2 %v2817_v4, %s2454_s29 }
 0x240   :  { %v860_v8 = vpop.permute.xlu1 %859  ;;  %1195 = vrot.lane.b32.xlu0 %v2841_v27, %s2454_s29 }
 0x241   :  { %933 = vst.msk [vmem:[#allocation4 + $0x2b0] sm:$0xff] %vm440_vm12, %v860_v8  ;;  %v3142_v37 = vsel %vm62_vm4, %v858_v53, %v860_v8  ;;  %v1016_v61 = vpop.permute.xlu2 %1015 }
 0x242   :  { %v1018_v36 = vpop.permute.xlu0 %1017 }
 0x243   :  { %v3145_v18 = vsel %vm73_vm6, %v1016_v61, %v1018_v36 }
 0x246   :  { %1187 = vrot.lane.b32.xlu1 %v2791_v50, %s2454_s29 }
 0x247   :  { %1175 = vrot.lane.b32.xlu2 %v2737_v9, %s2454_s29 }
 0x248   :  { %v1020_v10 = vpop.permute.xlu1 %1019  ;;  %1181 = vrot.lane.b32.xlu0 %v2765_v29, %s2454_s29 }
 0x249   :  { %1093 = vst.msk [vmem:[#allocation4 + $0x370] sm:$0xff] %vm440_vm12, %v1020_v10  ;;  %v1048_v52 = vsel %vm73_vm6, %v1018_v36, %v1020_v10  ;;  %v542_v7 = vpop.permute.xlu2 %541 }
 0x24a   :  { %1092 = vst [vmem:[#allocation4 + $0x368] sm:$0xff] %v1048_v52  ;;  %v544_v48 = vpop.permute.xlu0 %543 }
 0x24b   :  { %v3156_v53 = vsel %vm40_vm5, %v542_v7, %v544_v48 }
 0x24e   :  { %1183 = vrot.lane.b32.xlu1 %v2795_v20, %s2454_s29 }
 0x24f   :  { %1515 = vrot.lane.b32.xlu2 %v2841_v27, %s2459_s20 }
 0x250   :  { %v546_v8 = vpop.permute.xlu1 %545  ;;  %1177 = vrot.lane.b32.xlu0 %v2769_v30, %s2454_s29 }
 0x251   :  { %616 = vst.msk [vmem:[#allocation4 + $0x148] sm:$0xff] %vm440_vm12, %v546_v8  ;;  %v3166_v61 = vsel %vm40_vm5, %v544_v48, %v546_v8  ;;  %v702_v36 = vpop.permute.xlu2 %701 }
 0x252   :  { %v704_v10 = vpop.permute.xlu0 %703 }
 0x253   :  { %v3169_v52 = vsel %vm51_vm7, %v702_v36, %v704_v10 }
 0x256   :  { %1513 = vrot.lane.b32.xlu1 %v2670_v24, %s2459_s20 }
 0x257   :  { %1501 = vrot.lane.b32.xlu2 %v2765_v29, %s2459_s20 }
 0x258   :  { %v706_v7 = vpop.permute.xlu1 %705  ;;  %1507 = vrot.lane.b32.xlu0 %v2791_v50, %s2459_s20 }
 0x259   :  { %776 = vst.msk [vmem:[#allocation4 + $0x208] sm:$0xff] %vm440_vm12, %v706_v7  ;;  %v3179_v48 = vsel %vm51_vm7, %v704_v10, %v706_v7  ;;  %v862_v8 = vpop.permute.xlu2 %861 }
 0x25a   :  { %v864_v57 = vpop.permute.xlu0 %863 }
 0x25b   :  { %v3182_v36 = vsel %vm62_vm4, %v862_v8, %v864_v57 }
 0x25e   :  { %1509 = vrot.lane.b32.xlu1 %v2817_v4, %s2459_s20 }
 0x25f   :  { %1497 = vrot.lane.b32.xlu2 %v2769_v30, %s2459_s20 }
 0x260   :  { %v866_v24 = vpop.permute.xlu1 %865  ;;  %1503 = vrot.lane.b32.xlu0 %v2795_v20, %s2459_s20 }
 0x261   :  { %936 = vst.msk [vmem:[#allocation4 + $0x2c8] sm:$0xff] %vm440_vm12, %v866_v24  ;;  %v3192_v29 = vsel %vm62_vm4, %v864_v57, %v866_v24  ;;  %v1022_v50 = vpop.permute.xlu2 %1021 }
 0x262   :  { %v1024_v10 = vpop.permute.xlu0 %1023 }
 0x263   :  { %v3195_v7 = vsel %vm73_vm6, %v1022_v50, %v1024_v10 }
 0x266   :  { %1495 = vrot.lane.b32.xlu1 %v2737_v9, %s2459_s20 }
 0x267   :  { %1483 = vrot.lane.b32.xlu2 %v2718_v54, %s2459_s20 }
 0x268   :  { %v1026_v30 = vpop.permute.xlu1 %1025  ;;  %1489 = vrot.lane.b32.xlu0 %v2745_v12, %s2459_s20 }
 0x269   :  { %1096 = vst.msk [vmem:[#allocation4 + $0x388] sm:$0xff] %vm440_vm12, %v1026_v30  ;;  %v1050_v20 = vsel %vm73_vm6, %v1024_v10, %v1026_v30  ;;  %v548_v57 = vpop.permute.xlu2 %547 }
 0x26a   :  { %1095 = vst [vmem:[#allocation4 + $0x380] sm:$0xff] %v1050_v20  ;;  %v1172_v8 = vpop.permute.xlu0 %1171  ;;  %v2412_v20 = vld [vmem:[#allocation4 + $0xa8] sm:$0xff] }
 0x26e   :  { %1491 = vrot.lane.b32.xlu1 %v2778_v33, %s2459_s20 }
 0x26f   :  { %1479 = vrot.lane.b32.xlu2 %v2726_v59, %s2459_s20 }
 0x270   :  { %v1174_v9 = vpop.permute.xlu1 %1173  ;;  %1485 = vrot.lane.b32.xlu0 %v2750_v14, %s2459_s20 }
 0x271   :  { %1250 = vst.msk [vmem:[#allocation4 + $0x418] sm:$0xff] %vm440_vm12, %v1174_v9  ;;  %v1206_v54 = vsel %vm84_vm0, %v1172_v8, %v1174_v9  ;;  %v708_v12 = vpop.permute.xlu2 %707 }
 0x272   :  { %1249 = vst [vmem:[#allocation4 + $0x410] sm:$0xff] %v1206_v54  ;;  %v550_v24 = vpop.permute.xlu0 %549 }
 0x273   :  { %v571_v50 = vsel %vm40_vm5, %v548_v57, %v550_v24  ;;  %v3230_v57 = vld [vmem:[#allocation4] sm:$0xff] }
 0x276   :  { %1477 = vrot.lane.b32.xlu1 %v2678_v32, %s2459_s20 }
 0x277   :  { %1675 = vrot.lane.b32.xlu2 %v2841_v27, %s2458_s19 }
 0x278   :  { %v552_v59 = vpop.permute.xlu1 %551  ;;  %1517 = vrot.lane.b32.xlu0 %v3097_v45, %s2459_s20 }
 0x279   :  { %619 = vst.msk [vmem:[#allocation4 + $0x160] sm:$0xff] %vm440_vm12, %v552_v59  ;;  %v3222_v14 = vsel %vm40_vm5, %v550_v24, %v552_v59  ;;  %v868_v33 = vpop.permute.xlu2 %867 }
 0x27a   :  { %v710_v10 = vpop.permute.xlu0 %709 }
 0x27b   :  { %v3225_v30 = vsel %vm51_vm7, %v708_v12, %v710_v10 }
 0x27e   :  { %1673 = vrot.lane.b32.xlu1 %v2412_v20, %s2458_s19 }
 0x27f   :  { %1511 = vrot.lane.b32.xlu2 %v3049_v35, %s2459_s20 }
 0x280   :  { %v712_v32 = vpop.permute.xlu1 %711  ;;  %1471 = vrot.lane.b32.xlu0 %v3230_v57, %s2459_s20 }
 0x281   :  { %779 = vst.msk [vmem:[#allocation4 + $0x220] sm:$0xff] %vm440_vm12, %v712_v32  ;;  %v3236_v9 = vsel %vm51_vm7, %v710_v10, %v712_v32  ;;  %v1028_v54 = vpop.permute.xlu2 %1027 }
 0x282   :  { %v870_v12 = vpop.permute.xlu0 %869 }
 0x283   :  { %v3239_v24 = vsel %vm62_vm4, %v868_v33, %v870_v12 }
 0x286   :  { %1473 = vrot.lane.b32.xlu1 %v2696_v40, %s2459_s20 }
 0x287   :  { %1197 = vrot.lane.b32.xlu2 %v3097_v45, %s2454_s29 }
 0x288   :  { %v872_v59 = vpop.permute.xlu1 %871  ;;  %1667 = vrot.lane.b32.xlu0 %v2820_v5, %s2458_s19 }
 0x289   :  { %939 = vst.msk [vmem:[#allocation4 + $0x2e0] sm:$0xff] %vm440_vm12, %v872_v59  ;;  %v3249_v10 = vsel %vm62_vm4, %v870_v12, %v872_v59  ;;  %v1170_v32 = vpop.permute.xlu2 %1169 }
 0x28a   :  { %v1030_v15 = vpop.permute.xlu0 %1029  ;;  %v3252_v33 = vsel %vm84_vm0, %v1170_v32, %v1172_v8 }
 0x28b   :  { %v3255_v62 = vsel %vm73_vm6, %v1028_v54, %v1030_v15 }
 0x28e   :  { %1669 = vrot.lane.b32.xlu1 %v2817_v4, %s2458_s19 }
 0x28f   :  { %1505 = vrot.lane.b32.xlu2 %v2994_v23, %s2459_s20 }
 0x290   :  { %v1032_v40 = vpop.permute.xlu1 %1031  ;;  %1353 = vrot.lane.b32.xlu0 %v2412_v20, %s2457_s14 }
 0x291   :  { %1099 = vst.msk [vmem:[#allocation4 + $0x3a0] sm:$0xff] %vm440_vm12, %v1032_v40  ;;  %v1052_v12 = vsel %vm73_vm6, %v1030_v15, %v1032_v40  ;;  %v1194_v59 = vpop.permute.xlu2 %1193 }
 0x292   :  { %1098 = vst [vmem:[#allocation4 + $0x398] sm:$0xff] %v1052_v12  ;;  %v556_v8 = vpop.permute.xlu0 %555 }
 0x293   :  { %v573_v54 = vsel %vm40_vm5, %v2878_v31, %v556_v8 }
 0x294   :  { %1988 = vmatpush.msra.mxu3 %v573_v54 }
 0x296   :  { %1355 = vrot.lane.b32.xlu1 %v2841_v27, %s2457_s14  ;;  %1989 = vmatpush.msra.mxu3 %v571_v50 }
 0x297   :  { %1191 = vrot.lane.b32.xlu2 %v3049_v35, %s2454_s29 }
 0x298   :  { %v558_v4 = vpop.permute.xlu1 %557  ;;  %1661 = vrot.lane.b32.xlu0 %v2799_v51, %s2458_s19  ;;  %1990 = vmatpush.msra.mxu3 %v3156_v53 }
 0x299   :  { %622 = vst.msk [vmem:[#allocation4 + $0x178] sm:$0xff] %vm440_vm12, %v558_v4  ;;  %v3275_v15 = vsel %vm40_vm5, %v556_v8, %v558_v4  ;;  %v3277_v31 = vpop.permute.xlu2 %1189 }
 0x29a   :  { %v716_v32 = vpop.permute.xlu0 %715  ;;  %1991 = vmatpush.msra.mxu3 %v3108_v6 }
 0x29b   :  { %v3282_v27 = vsel %vm51_vm7, %v2890_v34, %v716_v32 }
 0x29c   :  { %1992 = vmatpush.msra.mxu3 %v3060_v47 }
 0x29e   :  { %1663 = vrot.lane.b32.xlu1 %v2824_v13, %s2458_s19  ;;  %1993 = vmatpush.msra.mxu3 %v3005_v39 }
 0x29f   :  { %1499 = vrot.lane.b32.xlu2 %v2952_v38, %s2459_s20 }
 0x2a0   :  { %v718_v35 = vpop.permute.xlu1 %717  ;;  %1347 = vrot.lane.b32.xlu0 %v2820_v5, %s2457_s14  ;;  %1994 = vmatpush.msra.mxu3 %v2950_v16 }
 0x2a1   :  { %782 = vst.msk [vmem:[#allocation4 + $0x238] sm:$0xff] %vm440_vm12, %v718_v35  ;;  %v3295_v34 = vsel %vm51_vm7, %v716_v32, %v718_v35  ;;  %v3297_v47 = vpop.permute.xlu2 %1175 }
 0x2a2   :  { %v876_v6 = vpop.permute.xlu0 %875  ;;  %1995 = vmatpush.msra.mxu3 %v2898_v43 }
 0x2a3   :  { %v893_v39 = vsel %vm62_vm4, %v2907_v46, %v876_v6 }
 0x2a4   :  { %1996 = vmatpush.msra.mxu3 %v2412_v20  ;;  %v3340_v20 = vld [vmem:[%s3770_s4] sm:$0xff] }
 0x2a6   :  { %1349 = vrot.lane.b32.xlu1 %v2846_v28, %s2457_s14  ;;  %1997 = vmatpush.msra.mxu3 %v2820_v5  ;;  %v2414_v28 = vld [vmem:[#allocation4 + $0x48] sm:$0xff] }
 0x2a7   :  { %1185 = vrot.lane.b32.xlu2 %v2994_v23, %s2454_s29  ;;  %v3323_v23 = vld [vmem:[#allocation4 + $0x30] sm:$0xff] }
 0x2a8   :  { %v878_v16 = vpop.permute.xlu1 %877  ;;  %1655 = vrot.lane.b32.xlu0 %v2773_v60, %s2458_s19  ;;  %1998 = vmatpush.msra.mxu3 %v2799_v51 }
 0x2a9   :  { %942 = vst.msk [vmem:[#allocation4 + $0x2f8] sm:$0xff] %vm440_vm12, %v878_v16  ;;  %v3312_v43 = vsel %vm62_vm4, %v876_v6, %v878_v16  ;;  %v3314_v46 = vpop.permute.xlu2 %1515  ;;  %v3435_v16 = vld [vmem:[#allocation4 + $0x20] sm:$0xff] }
 0x2aa   :  { %v1036_v53 = vpop.permute.xlu0 %1035  ;;  %1999 = vmatpush.msra.mxu3 %v2773_v60  ;;  %v3330_v60 = vld [vmem:[#allocation4 + $0x18] sm:$0xff] }
 0x2ab   :  { %v3319_v5 = vsel %vm73_vm6, %v2929_v1, %v1036_v53 }
 0x2ac   :  { %2000 = vmatpush.msra.mxu3 %v2414_v28 }
 0x2ae   :  { %1657 = vrot.lane.b32.xlu1 %v2804_v56, %s2458_s19  ;;  %2001 = vmatpush.msra.mxu3 %v3323_v23 }
 0x2af   :  { %1493 = vrot.lane.b32.xlu2 %v2783_v42, %s2459_s20 }
 0x2b0   :  { %v1038_v50 = vpop.permute.xlu1 %1037  ;;  %1341 = vrot.lane.b32.xlu0 %v2799_v51, %s2457_s14  ;;  %2002 = vmatpush.msra.mxu3 %v3330_v60 }
 0x2b1   :  { %1102 = vst.msk [vmem:[#allocation4 + $0x3b8] sm:$0xff] %vm440_vm12, %v1038_v50  ;;  %v1054_v1 = vsel %vm73_vm6, %v1036_v53, %v1038_v50  ;;  %v3335_v56 = vpop.permute.xlu2 %1501  ;;  %v1781_v50 = vld [vmem:[#allocation4 + $0xe0] sm:$0xff] }
 0x2b2   :  { %1101 = vst [vmem:[#allocation4 + $0x3b0] sm:$0xff] %v1054_v1  ;;  %v3342_v40 = vpop.permute.xlu0 %1195  ;;  %2003 = vmatpush.msra.mxu3 %v3230_v57 }
 0x2b3   :  { %v1213_v51 = vsel %vm84_vm0, %v1194_v59, %v3342_v40  ;;  %2004 = vmatmul.f32.vlgmr.msra.gmra.mxu3 %v3340_v20 }
 0x2b4   :  { %2011 = vmatpush.msrb.mxu3 %v893_v39  ;;  %2034 = vmatpush.msrb.mxu0 %v1213_v51 }
 0x2b6   :  { %2012 = vmatpush.msrb.mxu3 %v3239_v24  ;;  %1343 = vrot.lane.b32.xlu1 %v2824_v13, %s2457_s14  ;;  %v3363_v24 = vld [vmem:[%s3770_s4 + $0x28] sm:$0x3] }
 0x2b7   :  { %1179 = vrot.lane.b32.xlu2 %v2952_v38, %s2454_s29  ;;  %v3368_v38 = vld [vmem:[#allocation4 + $0x50] sm:$0xff] }
 0x2b8   :  { %2013 = vmatpush.msrb.mxu3 %v3182_v36  ;;  %v1188_v12 = vpop.permute.xlu1 %1187  ;;  %1649 = vrot.lane.b32.xlu0 %v2414_v28, %s2458_s19  ;;  %v2418_v36 = vld [vmem:[#allocation4 + $0x60] sm:$0xff] }
 0x2b9   :  { %v1211_v59 = vsel %vm84_vm0, %v1188_v12, %v3277_v31  ;;  %v3357_v8 = vpop.permute.xlu2 %1497 }
 0x2ba   :  { %2014 = vmatpush.msrb.mxu3 %v3132_v55  ;;  %v1182_v13 = vpop.permute.xlu0 %1181  ;;  %2035 = vmatpush.msrb.mxu0 %v1211_v59 }
 0x2bb   :  { %2007 = vmatmul.f32.gmra.mxu3 %v3363_v24 }
 0x2bc   :  { %2015 = vmatpush.msrb.mxu3 %v3084_v21  ;;  %v1825_v21 = vld [vmem:[#allocation4 + $0x240] sm:$0xff] }
 0x2be   :  { %2016 = vmatpush.msrb.mxu3 %v3027_v63  ;;  %1651 = vrot.lane.b32.xlu1 %v3368_v38, %s2458_s19 }
 0x2bf   :  { %1487 = vrot.lane.b32.xlu2 %v2756_v19, %s2459_s20 }
 0x2c0   :  { %2017 = vmatpush.msrb.mxu3 %v2972_v58  ;;  %v3375_v55 = vpop.permute.xlu1 %1183  ;;  %1335 = vrot.lane.b32.xlu0 %v2418_v36, %s2457_s14  ;;  %v3389_v58 = vld [vmem:[#allocation4 + $0x68] sm:$0xff]  ;;  %v1835_v36 = vld [vmem:[#allocation4 + $0x290] sm:$0xff] }
 0x2c1   :  { %v1209_v54 = vsel %vm84_vm0, %v1182_v13, %v3375_v55  ;;  %v3380_v63 = vpop.permute.xlu2 %1483  ;;  %v2424_v13 = vld [vmem:[#allocation4 + $0x98] sm:$0xff] }
 0x2c2   :  { %2018 = vmatpush.msrb.mxu3 %v1825_v21  ;;  %v3382_v4 = vpop.permute.xlu0 %1177  ;;  %2036 = vmatpush.msrb.mxu0 %v1209_v54  ;;  %v3497_v21 = vld [vmem:[%s3770_s4 + $0x30] sm:$0x3] }
 0x2c3   :  { %v1207_v32 = vsel %vm84_vm0, %v3297_v47, %v3382_v4 }
 0x2c4   :  { %2019 = vmatpush.msrb.mxu3 %v3282_v27  ;;  %2037 = vmatpush.msrb.mxu0 %v1207_v32 }
 0x2c6   :  { %2020 = vmatpush.msrb.mxu3 %v3225_v30  ;;  %1337 = vrot.lane.b32.xlu1 %v3389_v58, %s2457_s14 }
 0x2c7   :  { %2038 = vmatpush.msrb.mxu0 %v3252_v33  ;;  %1329 = vrot.lane.b32.xlu2 %v2414_v28, %s2457_s14  ;;  %v3407_v33 = vld [vmem:[#allocation4 + $0x38] sm:$0xff]  ;;  %v3454_v28 = vld [vmem:[%s3770_s4 + $0x10] sm:$0xff] }
 0x2c8   :  { %2021 = vmatpush.msrb.mxu3 %v3169_v52  ;;  %v1514_v35 = vpop.permute.xlu1 %1513  ;;  %1643 = vrot.lane.b32.xlu0 %v3323_v23, %s2458_s19  ;;  %v1873_v52 = vld [vmem:[#allocation4 + $0x3c0] sm:$0xff] }
 0x2c9   :  { %2039 = vmatpush.msrb.mxu0 %v3047_v11  ;;  %v1533_v30 = vsel %vm106_vm9, %v1514_v35, %v3314_v46  ;;  %v3401_v27 = vpop.permute.xlu2 %1479  ;;  %v1804_v11 = vld [vmem:[#allocation4 + $0x198] sm:$0xff] }
 0x2ca   :  { %2022 = vmatpush.msrb.mxu3 %v3121_v25  ;;  %v1508_v47 = vpop.permute.xlu0 %1507  ;;  %2057 = vmatpush.msra.mxu1 %v1533_v30  ;;  %v1829_v30 = vld [vmem:[#allocation4 + $0x260] sm:$0xff] }
 0x2cb   :  { %2040 = vmatpush.msrb.mxu0 %v2992_v22  ;;  %v1801_v22 = vld [vmem:[#allocation4 + $0x180] sm:$0xff] }
 0x2cc   :  { %2023 = vmatpush.msrb.mxu3 %v3073_v3 }
 0x2cd   :  { %2041 = vmatpush.msrb.mxu0 %v1873_v52 }
 0x2ce   :  { %2024 = vmatpush.msrb.mxu3 %v3016_v49  ;;  %1645 = vrot.lane.b32.xlu1 %v3407_v33, %s2458_s19 }
 0x2cf   :  { %2042 = vmatpush.msrb.mxu0 %v3319_v5  ;;  %1637 = vrot.lane.b32.xlu2 %v3330_v60, %s2458_s19  ;;  %v1849_v5 = vld [vmem:[#allocation4 + $0x300] sm:$0xff] }
 0x2d0   :  { %2025 = vmatpush.msrb.mxu3 %v1804_v11  ;;  %v1510_v25 = vpop.permute.xlu1 %1509  ;;  %1331 = vrot.lane.b32.xlu0 %v3368_v38, %s2457_s14  ;;  %v1808_v11 = vld [vmem:[#allocation4 + $0x1b8] sm:$0xff] }
 0x2d1   :  { %2043 = vmatpush.msrb.mxu0 %v3255_v62  ;;  %v1531_v49 = vsel %vm106_vm9, %v1508_v47, %v1510_v25  ;;  %v3418_v3 = vpop.permute.xlu2 %1675  ;;  %v1855_v62 = vld [vmem:[#allocation4 + $0x330] sm:$0xff] }
 0x2d2   :  { %2026 = vmatpush.msrb.mxu3 %v1801_v22  ;;  %v3420_v6 = vpop.permute.xlu0 %1503  ;;  %2058 = vmatpush.msra.mxu1 %v1531_v49 }
 0x2d3   :  { %2044 = vmatpush.msrb.mxu0 %v3195_v7  ;;  %v1529_v39 = vsel %vm106_vm9, %v3335_v56, %v3420_v6 }
 0x2d4   :  { %2103 = vmatpush.msra.mxu3 %v3275_v15  ;;  %2059 = vmatpush.msra.mxu1 %v1529_v39  ;;  %v3445_v15 = vld [vmem:[%s3770_s4 + $0x8] sm:$0xff] }
 0x2d5   :  { %2045 = vmatpush.msrb.mxu0 %v3145_v18  ;;  %2027 = vmatmul.f32.vlgmr.msrb.gmra.mxu3 %v3445_v15  ;;  %v3784_v39 = vld [vmem:[#allocation9_spill] sm:$0xff] }
 0x2d6   :  { %2104 = vmatpush.msra.mxu3 %v3222_v14  ;;  %1481 = vrot.lane.b32.xlu1 %v2730_v0, %s2459_s20 }
 0x2d7   :  { %2046 = vmatpush.msrb.mxu0 %v3095_v44  ;;  %1325 = vrot.lane.b32.xlu2 %v3407_v33, %s2457_s14  ;;  %v1852_v44 = vld [vmem:[#allocation4 + $0x318] sm:$0xff] }
 0x2d8   :  { %2105 = vmatpush.msra.mxu3 %v3166_v61  ;;  %v1496_v7 = vpop.permute.xlu1 %1495  ;;  %1639 = vrot.lane.b32.xlu0 %v3435_v16, %s2458_s19 }
 0x2d9   :  { %2047 = vmatpush.msrb.mxu0 %v1855_v62  ;;  %v1527_v18 = vsel %vm106_vm9, %v1496_v7, %v3357_v8  ;;  %v1512_v14 = vpop.permute.xlu2 %1511  ;;  %v1800_v62 = vld [vmem:[#allocation4 + $0x178] sm:$0xff]  ;;  %v3785_v7 = vld [vmem:[#allocation8_spill] sm:$0xff] }
 0x2da   :  { %2106 = vmatpush.msra.mxu3 %v3118_v17  ;;  %v1490_v61 = vpop.permute.xlu0 %1489  ;;  %v3448_v53 = vsel %vm106_vm9, %v1510_v25, %v1512_v14  ;;  %2060 = vmatpush.msra.mxu1 %v1527_v18  ;;  %1579 = vst.msk [vmem:[#allocation4 + $0x5e0] sm:$0xff] %vm440_vm12, %v1512_v14  ;;  %v1784_v17 = vld [vmem:[#allocation4 + $0xf8] sm:$0xff] }
 0x2db   :  { %2048 = vmatpush.msrb.mxu0 %v1852_v44 }
 0x2dc   :  { %2107 = vmatpush.msra.mxu3 %v3070_v2  ;;  %v3462_v2 = vld [vmem:[#allocation4 + $0x8] sm:$0xff] }
 0x2dd   :  { %2049 = vmatpush.msrb.mxu0 %v1849_v5  ;;  %2030 = vmatmul.f32.gmra.mxu3 %v3497_v21  ;;  %v1794_v5 = vld [vmem:[#allocation4 + $0x148] sm:$0xff] }
 0x2de   :  { %2108 = vmatpush.msra.mxu3 %v1784_v17  ;;  %1323 = vrot.lane.b32.xlu1 %v3323_v23, %s2457_s14  ;;  %v1791_v17 = vld [vmem:[#allocation4 + $0x130] sm:$0xff] }
 0x2df   :  { %2126 = vmatpush.msra.mxu0 %v3312_v43  ;;  %1633 = vrot.lane.b32.xlu2 %v3462_v2, %s2458_s19  ;;  %v1778_v43 = vld [vmem:[#allocation4 + $0xc8] sm:$0xff] }
 0x2e0   :  { %2050 = vmatmul.f32.vlgmr.msrb.gmra.mxu0 %v3454_v28  ;;  %2109 = vmatpush.msra.mxu3 %v1781_v50  ;;  %v3466_v1 = vpop.permute.xlu1 %1491  ;;  %v1788_v50 = vld [vmem:[#allocation4 + $0x118] sm:$0xff] }
 0x2e1   :  { %1475 = vrot.lane.b32.xlu0 %v2698_v41, %s2459_s20  ;;  %2127 = vmatpush.msra.mxu0 %v3249_v10  ;;  %v1525_v23 = vsel %vm106_vm9, %v1490_v61, %v3466_v1  ;;  %v1198_v56 = vpop.permute.xlu2 %1197  ;;  %v2423_v10 = vld [vmem:[#allocation4 + $0xb0] sm:$0xff] }
 0x2e2   :  { %2110 = vmatpush.msra.mxu3 %v1778_v43  ;;  %v3473_v51 = vpop.permute.xlu0 %1485  ;;  %v3477_v12 = vsel %vm84_vm0, %v3342_v40, %v1198_v56  ;;  %2061 = vmatpush.msra.mxu1 %v1525_v23  ;;  %1262 = vst.msk [vmem:[#allocation4 + $0x478] sm:$0xff] %vm440_vm12, %v1198_v56  ;;  %v2425_v40 = vld [vmem:[#allocation4 + $0x80] sm:$0xff] }
 0x2e3   :  { %2128 = vmatpush.msra.mxu0 %v3192_v29  ;;  %v1523_v59 = vsel %vm106_vm9, %v3380_v63, %v3473_v51  ;;  %v3490_v29 = vld [vmem:[%s3770_s4 + $0x38] sm:$0x3] }
 0x2e4   :  { %2111 = vmatpush.msra.mxu3 %v2423_v10  ;;  %2062 = vmatpush.msra.mxu1 %v1523_v59  ;;  %v1782_v10 = vld [vmem:[#allocation4 + $0xe8] sm:$0xff] }
 0x2e5   :  { %2129 = vmatpush.msra.mxu0 %v3142_v37  ;;  %v1832_v37 = vld [vmem:[#allocation4 + $0x278] sm:$0xff] }
 0x2e6   :  { %2112 = vmatpush.msra.mxu3 %v2424_v13  ;;  %1631 = vrot.lane.b32.xlu1 %v3230_v57, %s2458_s19  ;;  %v1776_v13 = vld [vmem:[#allocation4 + $0xb8] sm:$0xff] }
 0x2e7   :  { %2130 = vmatpush.msra.mxu0 %v1835_v36  ;;  %1357 = vrot.lane.b32.xlu2 %v3097_v45, %s2457_s14 }
 0x2e8   :  { %2113 = vmatpush.msra.mxu3 %v2425_v40  ;;  %v1478_v54 = vpop.permute.xlu1 %1477  ;;  %2053 = vmatmul.f32.gmra.mxu0 %v3490_v29 }
 0x2e9   :  { %1317 = vrot.lane.b32.xlu0 %v3330_v60, %s2457_s14  ;;  %2131 = vmatpush.msra.mxu0 %v1832_v37  ;;  %v1521_v63 = vsel %vm106_vm9, %v1478_v54, %v3401_v27  ;;  %v1506_v32 = vpop.permute.xlu2 %1505 }
 0x2ea   :  { %2114 = vmatpush.msra.mxu3 %v3389_v58  ;;  %v1518_v45 = vpop.permute.xlu0 %1517  ;;  %v3507_v35 = vsel %vm106_vm9, %v3420_v6, %v1506_v32  ;;  %2063 = vmatpush.msra.mxu1 %v1521_v63  ;;  %v1826_v58 = vld [vmem:[#allocation4 + $0x248] sm:$0xff]  ;;  %1576 = vst.msk [vmem:[#allocation4 + $0x5c8] sm:$0xff] %vm440_vm12, %v1506_v32  ;;  %v1805_v6 = vld [vmem:[#allocation4 + $0x1a0] sm:$0xff] }
 0x2eb   :  { %v3512_v60 = vsel %vm106_vm9, %v3314_v46, %v1518_v45  ;;  %1582 = vst.msk [vmem:[#allocation4 + $0x5f8] sm:$0xff] %vm440_vm12, %v1518_v45  ;;  %2132 = vmatpush.msra.mxu0 %v1829_v30  ;;  %v1770_v32 = vld [vmem:[#allocation4 + $0x88] sm:$0xff]  ;;  %v1969_v45 = vld [vmem:[%s3771_s5] sm:$0xff] }
 0x2ec   :  { %2115 = vmatpush.msra.mxu3 %v3368_v38  ;;  %v1767_v30 = vld [vmem:[#allocation4 + $0x70] sm:$0xff] }
 0x2ed   :  { %2133 = vmatpush.msra.mxu0 %v1826_v58  ;;  %v1764_v58 = vld [vmem:[#allocation4 + $0x58] sm:$0xff] }
 0x2ee   :  { %2116 = vmatpush.msra.mxu3 %v3407_v33  ;;  %1319 = vrot.lane.b32.xlu1 %v3435_v16, %s2457_s14 }
 0x2ef   :  { %1351 = vrot.lane.b32.xlu2 %v2837_v26, %s2457_s14  ;;  %2134 = vmatpush.msra.mxu0 %v3295_v34  ;;  %v3783_v34 = vld [vmem:[#allocation10_spill] sm:$0xff] }
 0x2f0   :  { %v1674_v46 = vpop.permute.xlu1 %1673  ;;  %2117 = vmatpush.msra.mxu3 %v3435_v16  ;;  %v1797_v16 = vld [vmem:[#allocation4 + $0x160] sm:$0xff] }
 0x2f1   :  { %1311 = vrot.lane.b32.xlu0 %v3230_v57, %s2457_s14  ;;  %v1693_v38 = vsel %vm117_vm8, %v1674_v46, %v3418_v3  ;;  %v1192_v47 = vpop.permute.xlu2 %1191  ;;  %2135 = vmatpush.msra.mxu0 %v3236_v9  ;;  %v1814_v57 = vld [vmem:[#allocation4 + $0x1e8] sm:$0xff]  ;;  %v1811_v9 = vld [vmem:[#allocation4 + $0x1d0] sm:$0xff] }
 0x2f2   :  { %v1472_v52 = vpop.permute.xlu0 %1471  ;;  %2088 = vmatpush.msrb.mxu2 %v1693_v38  ;;  %v3531_v33 = vsel %vm84_vm0, %v3277_v31, %v1192_v47  ;;  %2118 = vmatpush.msra.mxu3 %v3462_v2  ;;  %1259 = vst.msk [vmem:[#allocation4 + $0x460] sm:$0xff] %vm440_vm12, %v1192_v47 }
 0x2f3   :  { %2119 = vmatmul.f32.vlgmr.msra.gmra.mxu3 %v3340_v20  ;;  %2136 = vmatpush.msra.mxu0 %v3179_v48 }
 0x2f5   :  { %2137 = vmatpush.msra.mxu0 %v1814_v57 }
 0x2f6   :  { %1313 = vrot.lane.b32.xlu1 %v3462_v2, %s2457_s14 }
 0x2f7   :  { %1671 = vrot.lane.b32.xlu2 %v2837_v26, %s2458_s19  ;;  %2138 = vmatpush.msra.mxu0 %v1811_v9  ;;  %v1802_v26 = vld [vmem:[#allocation4 + $0x188] sm:$0xff] }
 0x2f8   :  { %v3541_v31 = vpop.permute.xlu1 %1473  ;;  %v1758_v9 = vld [vmem:[#allocation4 + $0x28] sm:$0xff] }
 0x2f9   :  { %1677 = vrot.lane.b32.xlu0 %v3783_v34, %s2458_s19  ;;  %v1519_v48 = vsel %vm106_vm9, %v1472_v52, %v3541_v31  ;;  %v1500_v25 = vpop.permute.xlu2 %1499  ;;  %2139 = vmatpush.msra.mxu0 %v1808_v11 }
 0x2fa   :  { %v1668_v22 = vpop.permute.xlu0 %1667  ;;  %v3549_v49 = vsel %vm106_vm9, %v3357_v8, %v1500_v25  ;;  %2064 = vmatpush.msra.mxu1 %v1519_v48  ;;  %1573 = vst.msk [vmem:[#allocation4 + $0x5b0] sm:$0xff] %vm440_vm12, %v1500_v25 }
 0x2fb   :  { %2140 = vmatpush.msra.mxu0 %v1805_v6  ;;  %2122 = vmatmul.f32.gmra.mxu3 %v3363_v24 }
 0x2fd   :  { %2141 = vmatpush.msra.mxu0 %v1802_v26 }
 0x2fe   :  { %1345 = vrot.lane.b32.xlu1 %v3784_v39, %s2457_s14  ;;  %2142 = vmatmul.f32.vlgmr.msra.gmra.mxu0 %v3445_v15 }
 0x2ff   :  { %1333 = vrot.lane.b32.xlu2 %v2783_v42, %s2457_s14  ;;  %2218 = vmatpush.msrb.mxu0 %v1800_v62 }
 0x300   :  { %v3558_v8 = vpop.permute.xlu1 %1669 }
 0x301   :  { %1339 = vrot.lane.b32.xlu0 %v3785_v7, %s2457_s14  ;;  %v1691_v18 = vsel %vm117_vm8, %v1668_v22, %v3558_v8  ;;  %v1186_v14 = vpop.permute.xlu2 %1185  ;;  %2219 = vmatpush.msrb.mxu0 %v1797_v16 }
 0x302   :  { %v1354_v44 = vpop.permute.xlu0 %1353  ;;  %v3566_v61 = vsel %vm84_vm0, %v3375_v55, %v1186_v14  ;;  %2089 = vmatpush.msrb.mxu2 %v1691_v18  ;;  %1256 = vst.msk [vmem:[#allocation4 + $0x448] sm:$0xff] %vm440_vm12, %v1186_v14  ;;  %v1785_v55 = vld [vmem:[#allocation4 + $0x100] sm:$0xff] }
 0x303   :  { %2220 = vmatpush.msrb.mxu0 %v1794_v5 }
 0x305   :  { %2221 = vmatpush.msrb.mxu0 %v1791_v17 }
 0x306   :  { %1665 = vrot.lane.b32.xlu1 %v3784_v39, %s2458_s19  ;;  %2145 = vmatmul.f32.gmra.mxu0 %v3497_v21 }
 0x307   :  { %1653 = vrot.lane.b32.xlu2 %v2783_v42, %s2458_s19  ;;  %2222 = vmatpush.msrb.mxu0 %v1788_v50  ;;  %v1779_v42 = vld [vmem:[#allocation4 + $0xd0] sm:$0xff] }
 0x308   :  { %v3574_v2 = vpop.permute.xlu1 %1355 }
 0x309   :  { %1659 = vrot.lane.b32.xlu0 %v3785_v7, %s2458_s19  ;;  %v1373_v43 = vsel %vm95_vm2, %v1354_v44, %v3574_v2  ;;  %v1494_v23 = vpop.permute.xlu2 %1493  ;;  %2223 = vmatpush.msrb.mxu0 %v1785_v55 }
 0x30a   :  { %v1662_v56 = vpop.permute.xlu0 %1661  ;;  %v3582_v59 = vsel %vm106_vm9, %v3466_v1, %v1494_v23  ;;  %2065 = vmatpush.msra.mxu1 %v1373_v43  ;;  %1570 = vst.msk [vmem:[#allocation4 + $0x598] sm:$0xff] %vm440_vm12, %v1494_v23  ;;  %v1773_v1 = vld [vmem:[#allocation4 + $0xa0] sm:$0xff] }
 0x30b   :  { %2224 = vmatpush.msrb.mxu0 %v1782_v10 }
 0x30d   :  { %2225 = vmatpush.msrb.mxu0 %v1779_v42 }
 0x30e   :  { %1327 = vrot.lane.b32.xlu1 %v2756_v19, %s2457_s14 }
 0x30f   :  { %1315 = vrot.lane.b32.xlu2 %v2698_v41, %s2457_s14  ;;  %2226 = vmatpush.msrb.mxu0 %v1776_v13 }
 0x310   :  { %v3589_v36 = vpop.permute.xlu1 %1663 }
 0x311   :  { %1321 = vrot.lane.b32.xlu0 %v2730_v0, %s2457_s14  ;;  %v1689_v40 = vsel %vm117_vm8, %v1662_v56, %v3589_v36  ;;  %v1180_v37 = vpop.permute.xlu2 %1179  ;;  %2227 = vmatpush.msrb.mxu0 %v1773_v1 }
 0x312   :  { %v1348_v54 = vpop.permute.xlu0 %1347  ;;  %v3597_v63 = vsel %vm84_vm0, %v3382_v4, %v1180_v37  ;;  %2090 = vmatpush.msrb.mxu2 %v1689_v40  ;;  %1253 = vst.msk [vmem:[#allocation4 + $0x430] sm:$0xff] %vm440_vm12, %v1180_v37  ;;  %v1761_v4 = vld [vmem:[#allocation4 + $0x40] sm:$0xff] }
 0x313   :  { %2228 = vmatpush.msrb.mxu0 %v1770_v32 }
 0x315   :  { %2229 = vmatpush.msrb.mxu0 %v1767_v30 }
 0x316   :  { %1647 = vrot.lane.b32.xlu1 %v2756_v19, %s2458_s19  ;;  %v1755_v19 = vld [vmem:[#allocation4 + $0x10] sm:$0xff] }
 0x317   :  { %1973 = vperm.xlu2 %2409, %v1969_v45   ;;  %2230 = vmatpush.msrb.mxu0 %v1764_v58  ;;  %v3667_v58 = vld [vmem:[%s3770_s4 + $0x20] sm:$0xff] }
 0x318   :  { %v1350_v46 = vpop.permute.xlu1 %1349 }
 0x319   :  { %1641 = vrot.lane.b32.xlu0 %v2730_v0, %s2458_s19  ;;  %v1371_v38 = vsel %vm95_vm2, %v1348_v54, %v1350_v46  ;;  %v1488_v47 = vpop.permute.xlu2 %1487  ;;  %2231 = vmatpush.msrb.mxu0 %v1761_v4  ;;  %v1970_v0 = vld [vmem:[%s3771_s5 + $0x8] sm:$0x3] }
 0x31a   :  { %v1656_v52 = vpop.permute.xlu0 %1655  ;;  %v3610_v57 = vsel %vm106_vm9, %v3473_v51, %v1488_v47  ;;  %2066 = vmatpush.msra.mxu1 %v1371_v38  ;;  %1567 = vst.msk [vmem:[#allocation4 + $0x580] sm:$0xff] %vm440_vm12, %v1488_v47 }
 0x31b   :  { %2232 = vmatpush.msrb.mxu0 %v1758_v9 }
 0x31d   :  { %2233 = vmatpush.msrb.mxu0 %v1755_v19 }
 0x31e   :  { %1635 = vrot.lane.b32.xlu1 %v2698_v41, %s2458_s19  ;;  %2234 = vmatmul.f32.vlgmr.msrb.gmra.mxu0 %v3340_v20 }
 0x320   :  { %v3619_v34 = vpop.permute.xlu1 %1657 }
 0x321   :  { %1978 = vperm.xlu0 %2410, %v1970_v0   ;;  %v1687_v51 = vsel %vm117_vm8, %v1656_v52, %v3619_v34  ;;  %v1330_v11 = vpop.permute.xlu2 %1329 }
 0x322   :  { %v1342_v48 = vpop.permute.xlu0 %1341  ;;  %2091 = vmatpush.msrb.mxu2 %v1687_v51 }
 0x326   :  { %2237 = vmatmul.f32.gmra.mxu0 %v3363_v24 }
 0x328   :  { %v3624_v25 = vpop.permute.xlu1 %1343 }
 0x329   :  { %v1369_v22 = vsel %vm95_vm2, %v1342_v48, %v3624_v25  ;;  %v1638_v6 = vpop.permute.xlu2 %1637 }
 0x32a   :  { %v1650_v41 = vpop.permute.xlu0 %1649  ;;  %2067 = vmatpush.msra.mxu1 %v1369_v22  ;;  %v1877_v22 = vld [vmem:[#allocation4 + $0x3e0] sm:$0xff] }
 0x330   :  { %v1652_v20 = vpop.permute.xlu1 %1651 }
 0x331   :  { %v1685_v26 = vsel %vm117_vm8, %v1650_v41, %v1652_v20  ;;  %v3629_v39 = vpop.permute.xlu2 %1325  ;;  %v1874_v41 = vld [vmem:[#allocation4 + $0x3c8] sm:$0xff] }
 0x332   :  { %v1336_v62 = vpop.permute.xlu0 %1335  ;;  %2092 = vmatpush.msrb.mxu2 %v1685_v26 }
 0x338   :  { %v3631_v7 = vpop.permute.xlu1 %1337 }
 0x339   :  { %v1367_v24 = vsel %vm95_vm2, %v1336_v62, %v3631_v7  ;;  %v3635_v16 = vpop.permute.xlu2 %1633  ;;  %v1871_v62 = vld [vmem:[#allocation4 + $0x3b0] sm:$0xff] }
 0x33a   :  { %v1644_v18 = vpop.permute.xlu0 %1643  ;;  %2068 = vmatpush.msra.mxu1 %v1367_v24  ;;  %v1865_v24 = vld [vmem:[#allocation4 + $0x380] sm:$0xff] }
 0x340   :  { %v3637_v14 = vpop.permute.xlu1 %1645 }
 0x341   :  { %v1683_v44 = vsel %vm117_vm8, %v1644_v18, %v3637_v14  ;;  %v1358_v5 = vpop.permute.xlu2 %1357 }
 0x342   :  { %v1332_v17 = vpop.permute.xlu0 %1331  ;;  %v1374_v50 = vsel %vm95_vm2, %v3574_v2, %v1358_v5  ;;  %2093 = vmatpush.msrb.mxu2 %v1683_v44  ;;  %1422 = vst.msk [vmem:[#allocation4 + $0x538] sm:$0xff] %vm440_vm12, %v1358_v5  ;;  %v1862_v5 = vld [vmem:[#allocation4 + $0x368] sm:$0xff] }
 0x343   :  { %v1365_v55 = vsel %vm95_vm2, %v1330_v11, %v1332_v17 }
 0x344   :  { %2069 = vmatpush.msra.mxu1 %v1365_v55  ;;  %v1859_v55 = vld [vmem:[#allocation4 + $0x350] sm:$0xff] }
 0x348   :  { %v1482_v43 = vpop.permute.xlu1 %1481 }
 0x349   :  { %v1522_v23 = vsel %vm106_vm9, %v3401_v27, %v1482_v43  ;;  %1564 = vst.msk [vmem:[#allocation4 + $0x568] sm:$0xff] %vm440_vm12, %v1482_v43  ;;  %v1352_v56 = vpop.permute.xlu2 %1351 }
 0x34a   :  { %v3648_v10 = vpop.permute.xlu0 %1639  ;;  %v1372_v42 = vsel %vm95_vm2, %v1350_v46, %v1352_v56  ;;  %1419 = vst.msk [vmem:[#allocation4 + $0x520] sm:$0xff] %vm440_vm12, %v1352_v56  ;;  %v1896_v56 = vld [vmem:[#allocation4 + $0x478] sm:$0xff] }
 0x34b   :  { %v1681_v2 = vsel %vm117_vm8, %v1638_v6, %v3648_v10 }
 0x34c   :  { %2094 = vmatpush.msrb.mxu2 %v1681_v2 }
 0x350   :  { %v1324_v13 = vpop.permute.xlu1 %1323 }
 0x351   :  { %v1363_v1 = vsel %vm95_vm2, %v1324_v13, %v3629_v39  ;;  %v1672_v40 = vpop.permute.xlu2 %1671  ;;  %v1850_v13 = vld [vmem:[#allocation4 + $0x308] sm:$0xff] }
 0x352   :  { %2070 = vmatpush.msra.mxu1 %v1363_v1  ;;  %v1692_v27 = vsel %vm117_vm8, %v3558_v8, %v1672_v40  ;;  %1739 = vst.msk [vmem:[#allocation4 + $0x6a0] sm:$0xff] %vm440_vm12, %v1672_v40  ;;  %v1893_v40 = vld [vmem:[#allocation4 + $0x460] sm:$0xff] }
 0x353   :  { %v1476_v37 = vpop.permute.xlu0 %1475 }
 0x354   :  { %v1520_v54 = vsel %vm106_vm9, %v3541_v31, %v1476_v37  ;;  %1561 = vst.msk [vmem:[#allocation4 + $0x550] sm:$0xff] %vm440_vm12, %v1476_v37 }
 0x358   :  { %v1632_v32 = vpop.permute.xlu1 %1631 }
 0x359   :  { %v1679_v45 = vsel %vm117_vm8, %v1632_v32, %v3635_v16  ;;  %v1334_v30 = vpop.permute.xlu2 %1333  ;;  %v1965_v48 = vld [vmem:[#allocation4 + $0x6a0] sm:$0xff]  ;;  %v1887_v32 = vld [vmem:[#allocation4 + $0x430] sm:$0xff] }
 0x35a   :  { %2095 = vmatpush.msrb.mxu2 %v1679_v45  ;;  %v1366_v8 = vsel %vm95_vm2, %v1332_v17, %v1334_v30  ;;  %1410 = vst.msk [vmem:[#allocation4 + $0x4d8] sm:$0xff] %vm440_vm12, %v1334_v30  ;;  %v1842_v45 = vld [vmem:[#allocation4 + $0x2c8] sm:$0xff] }
 0x35b   :  { %v1318_v46 = vpop.permute.xlu0 %1317  ;;  %2388 = vmatmul.msk.f32.vlgmr.msrb.gmra.mxu2 %vm1981_vm13, %v3667_v58 }
 0x35c   :  { %2172 = vmatpush.msra.mxu2 %v3512_v60  ;;  %v3684_v60 = vld [vmem:[%s3770_s4 + $0x48] sm:$0x3] }
 0x35e   :  { %2173 = vmatpush.msra.mxu2 %v3448_v53 }
 0x360   :  { %2174 = vmatpush.msra.mxu2 %v3507_v35  ;;  %v3676_v31 = vpop.permute.xlu1 %1319  ;;  %v3695_v35 = vld [vmem:[%s3770_s4 + $0x18] sm:$0xff] }
 0x361   :  { %v1361_v4 = vsel %vm95_vm2, %v1318_v46, %v3676_v31  ;;  %v1654_v38 = vpop.permute.xlu2 %1653 }
 0x362   :  { %2175 = vmatpush.msra.mxu2 %v3549_v49  ;;  %v1686_v52 = vsel %vm117_vm8, %v1652_v20, %v1654_v38  ;;  %2071 = vmatpush.msra.mxu1 %v1361_v4  ;;  %1730 = vst.msk [vmem:[#allocation4 + $0x658] sm:$0xff] %vm440_vm12, %v1654_v38  ;;  %v1836_v38 = vld [vmem:[#allocation4 + $0x298] sm:$0xff] }
 0x363   :  { %v1312_v47 = vpop.permute.xlu0 %1311  ;;  %2389 = vmatmul.msk.f32.gmra.mxu2 %vm1981_vm13, %v3684_v60 }
 0x364   :  { %2176 = vmatpush.msra.mxu2 %v3582_v59 }
 0x366   :  { %2177 = vmatpush.msra.mxu2 %v3610_v57 }
 0x368   :  { %2178 = vmatpush.msra.mxu2 %v1522_v23  ;;  %v1314_v53 = vpop.permute.xlu1 %1313  ;;  %v1853_v23 = vld [vmem:[#allocation4 + $0x320] sm:$0xff] }
 0x369   :  { %v1359_v49 = vsel %vm95_vm2, %v1312_v47, %v1314_v53  ;;  %v1316_v9 = vpop.permute.xlu2 %1315  ;;  %v1956_v43 = vld [vmem:[#allocation4 + $0x658] sm:$0xff] }
 0x36a   :  { %2179 = vmatpush.msra.mxu2 %v1520_v54  ;;  %v3699_v59 = vsel %vm95_vm2, %v1314_v53, %v1316_v9  ;;  %2072 = vmatpush.msra.mxu1 %v1359_v49  ;;  %1401 = vst.msk [vmem:[#allocation4 + $0x490] sm:$0xff] %vm440_vm12, %v1316_v9  ;;  %v1890_v54 = vld [vmem:[#allocation4 + $0x448] sm:$0xff]  ;;  %v1944_v47 = vld [vmem:[#allocation4 + $0x5f8] sm:$0xff]  ;;  %v1833_v53 = vld [vmem:[#allocation4 + $0x280] sm:$0xff] }
 0x36b   :  { %v1678_v19 = vpop.permute.xlu0 %1677  ;;  %2073 = vmatmul.f32.vlgmr.msra.gmra.mxu1 %v3695_v35  ;;  %v1878_v49 = vld [vmem:[#allocation4 + $0x3e8] sm:$0xff] }
 0x36c   :  { %v1694_v0 = vsel %vm117_vm8, %v3418_v3, %v1678_v19  ;;  %1742 = vst.msk [vmem:[#allocation4 + $0x6b8] sm:$0xff] %vm440_vm12, %v1678_v19  ;;  %2180 = vmatpush.msra.mxu2 %v1374_v50  ;;  %2149 = vmatpush.msrb.mxu1 %v3477_v12  ;;  %v3712_v3 = vld [vmem:[%s3770_s4 + $0x40] sm:$0x3]  ;;  %v1830_v9 = vld [vmem:[#allocation4 + $0x268] sm:$0xff]  ;;  %s2462_s4 = smov [#allocation5]  }
 0x36d   :  { %2203 = vmatpush.msrb.mxu3 %v1694_v0  ;;  %v1827_v0 = vld [vmem:[#allocation4 + $0x250] sm:$0xff]  ;;  %s2350_s16 = sshll.u32 %s2462_s4, 4  ;;  %s2351_s16 = int_to_ptr.vmem [resolvable:$true] %s2350_s16 }
 0x36e   :  { %2181 = vmatpush.msra.mxu2 %v1372_v42  ;;  %2150 = vmatpush.msrb.mxu1 %v3531_v33 }
 0x36f   :  { %2204 = vmatpush.msrb.mxu3 %v1692_v27  ;;  %v1848_v27 = vld [vmem:[#allocation4 + $0x2f8] sm:$0xff] }
 0x370   :  { %v1346_v57 = vpop.permute.xlu1 %1345  ;;  %2151 = vmatpush.msrb.mxu1 %v3566_v61  ;;  %v1883_v61 = vld [vmem:[#allocation4 + $0x410] sm:$0xff] }
 0x371   :  { %v1370_v51 = vsel %vm95_vm2, %v3624_v25, %v1346_v57  ;;  %1416 = vst.msk [vmem:[#allocation4 + $0x508] sm:$0xff] %vm440_vm12, %v1346_v57  ;;  %v1880_v25 = vld [vmem:[#allocation4 + $0x3f8] sm:$0xff]  ;;  %v1875_v57 = vld [vmem:[#allocation4 + $0x3d0] sm:$0xff] }
 0x372   :  { %2182 = vmatpush.msra.mxu2 %v1370_v51  ;;  %2152 = vmatpush.msrb.mxu1 %v3597_v63  ;;  %v1935_v51 = vld [vmem:[#allocation4 + $0x5b0] sm:$0xff] }
 0x373   :  { %v1340_v12 = vpop.permute.xlu0 %1339  ;;  %v1968_v11 = vld [vmem:[#allocation4 + $0x6b8] sm:$0xff]  ;;  %2076 = vmatmul.f32.gmra.mxu1 %v3712_v3 }
 0x374   :  { %v1368_v33 = vsel %vm95_vm2, %v3631_v7, %v1340_v12  ;;  %1413 = vst.msk [vmem:[#allocation4 + $0x4f0] sm:$0xff] %vm440_vm12, %v1340_v12  ;;  %2318 = vmatpush.msra.mxu0 %v1968_v11  ;;  %2153 = vmatpush.msrb.mxu1 %v1883_v61  ;;  %v1868_v7 = vld [vmem:[#allocation4 + $0x398] sm:$0xff]  ;;  %v1821_v61 = vld [vmem:[#allocation4 + $0x220] sm:$0xff] }
 0x375   :  { %2183 = vmatpush.msra.mxu2 %v1368_v33  ;;  %v1824_v12 = vld [vmem:[#allocation4 + $0x238] sm:$0xff] }
 0x376   :  { %2319 = vmatpush.msra.mxu0 %v1965_v48  ;;  %2154 = vmatpush.msrb.mxu1 %v1880_v25  ;;  %v1872_v11 = vld [vmem:[#allocation4 + $0x3b8] sm:$0xff]  ;;  %v1869_v48 = vld [vmem:[#allocation4 + $0x3a0] sm:$0xff] }
 0x377   :  { %2184 = vmatpush.msra.mxu2 %v1366_v8  ;;  %v1932_v33 = vld [vmem:[#allocation4 + $0x598] sm:$0xff]  ;;  %v1929_v25 = vld [vmem:[#allocation4 + $0x580] sm:$0xff] }
 0x378   :  { %v1666_v6 = vpop.permute.xlu1 %1665  ;;  %2155 = vmatpush.msrb.mxu1 %v1877_v22  ;;  %v1818_v22 = vld [vmem:[#allocation4 + $0x208] sm:$0xff] }
 0x379   :  { %v1690_v63 = vsel %vm117_vm8, %v3589_v36, %v1666_v6  ;;  %1736 = vst.msk [vmem:[#allocation4 + $0x688] sm:$0xff] %vm440_vm12, %v1666_v6  ;;  %v1866_v6 = vld [vmem:[#allocation4 + $0x388] sm:$0xff] }
 0x37a   :  { %2205 = vmatpush.msrb.mxu3 %v1690_v63  ;;  %2156 = vmatpush.msrb.mxu1 %v1874_v41  ;;  %v1926_v63 = vld [vmem:[#allocation4 + $0x568] sm:$0xff]  ;;  %v1815_v41 = vld [vmem:[#allocation4 + $0x1f0] sm:$0xff] }
 0x37b   :  { %v1660_v20 = vpop.permute.xlu0 %1659 }
 0x37c   :  { %v1688_v26 = vsel %vm117_vm8, %v3619_v34, %v1660_v20  ;;  %1733 = vst.msk [vmem:[#allocation4 + $0x670] sm:$0xff] %vm440_vm12, %v1660_v20  ;;  %2157 = vmatpush.msrb.mxu1 %v1871_v62  ;;  %v1923_v20 = vld [vmem:[#allocation4 + $0x550] sm:$0xff]  ;;  %v1860_v62 = vld [vmem:[#allocation4 + $0x358] sm:$0xff] }
 0x37d   :  { %2206 = vmatpush.msrb.mxu3 %v1688_v26  ;;  %v1812_v26 = vld [vmem:[#allocation4 + $0x1d8] sm:$0xff] }
 0x37e   :  { %2158 = vmatpush.msrb.mxu1 %v1868_v7  ;;  %v1920_v7 = vld [vmem:[#allocation4 + $0x538] sm:$0xff] }
 0x37f   :  { %2207 = vmatpush.msrb.mxu3 %v1686_v52  ;;  %v1881_v52 = vld [vmem:[#allocation4 + $0x400] sm:$0xff] }
 0x380   :  { %v1328_v18 = vpop.permute.xlu1 %1327  ;;  %v1962_v36 = vld [vmem:[#allocation4 + $0x688] sm:$0xff]  ;;  %2159 = vmatpush.msrb.mxu1 %v1865_v24  ;;  %v1809_v24 = vld [vmem:[#allocation4 + $0x1c0] sm:$0xff] }
 0x381   :  { %v1364_v44 = vsel %vm95_vm2, %v3629_v39, %v1328_v18  ;;  %1407 = vst.msk [vmem:[#allocation4 + $0x4c0] sm:$0xff] %vm440_vm12, %v1328_v18  ;;  %2320 = vmatpush.msra.mxu0 %v1962_v36  ;;  %v1856_v39 = vld [vmem:[#allocation4 + $0x338] sm:$0xff]  ;;  %v1857_v18 = vld [vmem:[#allocation4 + $0x340] sm:$0xff] }
 0x382   :  { %2185 = vmatpush.msra.mxu2 %v1364_v44  ;;  %2160 = vmatpush.msrb.mxu1 %v1862_v5  ;;  %v1917_v36 = vld [vmem:[#allocation4 + $0x520] sm:$0xff]  ;;  %v1806_v44 = vld [vmem:[#allocation4 + $0x1a8] sm:$0xff] }
 0x383   :  { %v1322_v34 = vpop.permute.xlu0 %1321  ;;  %v1959_v17 = vld [vmem:[#allocation4 + $0x670] sm:$0xff]  ;;  %v1854_v5 = vld [vmem:[#allocation4 + $0x328] sm:$0xff] }
 0x384   :  { %v1362_v50 = vsel %vm95_vm2, %v3676_v31, %v1322_v34  ;;  %1404 = vst.msk [vmem:[#allocation4 + $0x4a8] sm:$0xff] %vm440_vm12, %v1322_v34  ;;  %2321 = vmatpush.msra.mxu0 %v1959_v17  ;;  %2161 = vmatpush.msrb.mxu1 %v1859_v55  ;;  %v1839_v31 = vld [vmem:[#allocation4 + $0x2b0] sm:$0xff]  ;;  %v1914_v34 = vld [vmem:[#allocation4 + $0x508] sm:$0xff]  ;;  %v1908_v55 = vld [vmem:[#allocation4 + $0x4d8] sm:$0xff] }
 0x385   :  { %2186 = vmatpush.msra.mxu2 %v1362_v50  ;;  %v1803_v17 = vld [vmem:[#allocation4 + $0x190] sm:$0xff] }
 0x386   :  { %2322 = vmatpush.msra.mxu0 %v1956_v43  ;;  %2162 = vmatpush.msrb.mxu1 %v1856_v39  ;;  %v1851_v50 = vld [vmem:[#allocation4 + $0x310] sm:$0xff] }
 0x387   :  { %2187 = vmatpush.msra.mxu2 %v3699_v59  ;;  %v1938_v59 = vld [vmem:[#allocation4 + $0x5c8] sm:$0xff] }
 0x388   :  { %2188 = vmatmul.f32.vlgmr.msra.gmra.mxu2 %v3695_v35  ;;  %v1648_v42 = vpop.permute.xlu1 %1647  ;;  %2163 = vmatpush.msrb.mxu1 %v1853_v23  ;;  %v1905_v43 = vld [vmem:[#allocation4 + $0x4c0] sm:$0xff]  ;;  %v1899_v23 = vld [vmem:[#allocation4 + $0x490] sm:$0xff] }
 0x389   :  { %2264 = vmatpush.msrb.mxu2 %v1896_v56  ;;  %v1684_v2 = vsel %vm117_vm8, %v3637_v14, %v1648_v42  ;;  %1727 = vst.msk [vmem:[#allocation4 + $0x640] sm:$0xff] %vm440_vm12, %v1648_v42  ;;  %v1845_v14 = vld [vmem:[#allocation4 + $0x2e0] sm:$0xff]  ;;  %v1974_v42 = vpop.permute.xlu2 %1973 }
 0x38a   :  { %2208 = vmatpush.msrb.mxu3 %v1684_v2  ;;  %2164 = vmatpush.msrb.mxu1 %v1850_v13 }
 0x38b   :  { %v1642_v1 = vpop.permute.xlu0 %1641  ;;  %2165 = vmatmul.f32.vlgmr.msrb.gmra.mxu1 %v3454_v28  ;;  %2265 = vmatpush.msrb.mxu2 %v1893_v40  ;;  %v1902_v39 = vld [vmem:[#allocation4 + $0x4a8] sm:$0xff] }
 0x38c   :  { %v1682_v37 = vsel %vm117_vm8, %v3648_v10, %v1642_v1  ;;  %1724 = vst.msk [vmem:[#allocation4 + $0x628] sm:$0xff] %vm440_vm12, %v1642_v1  ;;  %2241 = vmatpush.msra.mxu1 %v1848_v27  ;;  %v1884_v10 = vld [vmem:[#allocation4 + $0x418] sm:$0xff]  ;;  %v2051_v1 = vpop.f32.mrf.mxu0 }
 0x38d   :  { %2209 = vmatpush.msrb.mxu3 %v1682_v37  ;;  %2266 = vmatpush.msrb.mxu2 %v1890_v54 }
 0x38e   :  { %2242 = vmatpush.msra.mxu1 %v1845_v14 }
 0x38f   :  { %2267 = vmatpush.msrb.mxu2 %v1887_v32 }
 0x390   :  { %v1636_v30 = vpop.permute.xlu1 %1635  ;;  %v1953_v46 = vld [vmem:[#allocation4 + $0x640] sm:$0xff]  ;;  %2243 = vmatpush.msra.mxu1 %v1842_v45  ;;  %2191 = vmatmul.f32.gmra.mxu2 %v3712_v3 }
 0x391   :  { %v1680_v8 = vsel %vm117_vm8, %v3635_v16, %v1636_v30  ;;  %1721 = vst.msk [vmem:[#allocation4 + $0x610] sm:$0xff] %vm440_vm12, %v1636_v30  ;;  %2323 = vmatpush.msra.mxu0 %v1953_v46  ;;  %2268 = vmatpush.msrb.mxu2 %v1884_v10  ;;  %v1941_v16 = vld [vmem:[#allocation4 + $0x5e0] sm:$0xff] }
 0x392   :  { %2244 = vmatpush.msra.mxu1 %v1839_v31  ;;  %2210 = vmatpush.msrb.mxu3 %v1680_v8 }
 0x393   :  { %v1950_v4 = vld [vmem:[#allocation4 + $0x628] sm:$0xff]  ;;  %2168 = vmatmul.f32.gmra.mxu1 %v3490_v29  ;;  %2390 = vmatmul.msk.f32.vlgmr.msrb.gmra.mxu3 %vm1981_vm13, %v3667_v58  ;;  %v1979_v40 = vpop.permute.xlu0 %1978 }
 0x394   :  { %2324 = vmatpush.msra.mxu0 %v1950_v4  ;;  %2245 = vmatpush.msra.mxu1 %v1836_v38 }
 0x395   :  { %2287 = vmatpush.msra.mxu3 %v1944_v47  ;;  %2269 = vmatpush.msrb.mxu2 %v1881_v52 }
 0x396   :  { %2246 = vmatpush.msra.mxu1 %v1833_v53 }
 0x397   :  { %2288 = vmatpush.msra.mxu3 %v1941_v16  ;;  %2270 = vmatpush.msrb.mxu2 %v1878_v49 }
 0x398   :  { %v1947_v19 = vld [vmem:[#allocation4 + $0x610] sm:$0xff]  ;;  %2247 = vmatpush.msra.mxu1 %v1830_v9 }
 0x399   :  { %2325 = vmatpush.msra.mxu0 %v1947_v19  ;;  %2289 = vmatpush.msra.mxu3 %v1938_v59 }
 0x39a   :  { %2248 = vmatpush.msra.mxu1 %v1827_v0  ;;  %2271 = vmatpush.msrb.mxu2 %v1875_v57 }
 0x39b   :  { %2290 = vmatpush.msra.mxu3 %v1935_v51  ;;  %2392 = vmatmul.msk.f32.vlgmr.msra.gmra.mxu0 %vm1981_vm13, %v3667_v58  ;;  %v1863_v58 = vld [vmem:[#allocation4 + $0x370] sm:$0xff] }
 0x39c   :  { %2249 = vmatpush.msra.mxu1 %v1824_v12  ;;  %2391 = vmatmul.msk.f32.gmra.mxu3 %vm1981_vm13, %v3684_v60 }
 0x39d   :  { %2272 = vmatpush.msrb.mxu2 %v1872_v11  ;;  %2291 = vmatpush.msra.mxu3 %v1932_v33 }
 0x39e   :  { %2250 = vmatpush.msra.mxu1 %v1821_v61 }
 0x39f   :  { %2273 = vmatpush.msrb.mxu2 %v1869_v48  ;;  %2292 = vmatpush.msra.mxu3 %v1929_v25 }
 0x3a0   :  { %2251 = vmatpush.msra.mxu1 %v1818_v22 }
 0x3a1   :  { %2274 = vmatpush.msrb.mxu2 %v1866_v6  ;;  %2293 = vmatpush.msra.mxu3 %v1926_v63 }
 0x3a2   :  { %2252 = vmatpush.msra.mxu1 %v1815_v41 }
 0x3a3   :  { %2275 = vmatpush.msrb.mxu2 %v1863_v58  ;;  %2294 = vmatpush.msra.mxu3 %v1923_v20 }
 0x3a4   :  { %2253 = vmatpush.msra.mxu1 %v1812_v26  ;;  %2393 = vmatmul.msk.f32.gmra.mxu0 %vm1981_vm13, %v3684_v60  ;;  %v1911_v60 = vld [vmem:[#allocation4 + $0x4f0] sm:$0xff] }
 0x3a5   :  { %2276 = vmatpush.msrb.mxu2 %v1860_v62  ;;  %2295 = vmatpush.msra.mxu3 %v1920_v7 }
 0x3a6   :  { %2254 = vmatpush.msra.mxu1 %v1809_v24 }
 0x3a7   :  { %2277 = vmatpush.msrb.mxu2 %v1857_v18  ;;  %2296 = vmatpush.msra.mxu3 %v1917_v36 }
 0x3a8   :  { %2255 = vmatpush.msra.mxu1 %v1806_v44 }
 0x3a9   :  { %2278 = vmatpush.msrb.mxu2 %v1854_v5  ;;  %2297 = vmatpush.msra.mxu3 %v1914_v34 }
 0x3aa   :  { %2256 = vmatpush.msra.mxu1 %v1803_v17 }
 0x3ab   :  { %2257 = vmatmul.f32.vlgmr.msra.gmra.mxu1 %v3445_v15  ;;  %2279 = vmatpush.msrb.mxu2 %v1851_v50  ;;  %v2005_v15 = vpop.f32.mrf.mxu3 }
 0x3ac   :  { %2298 = vmatpush.msra.mxu3 %v1911_v60  ;;  %2280 = vmatmul.f32.vlgmr.msrb.gmra.mxu2 %v3454_v28  ;;  %v2006_v28 = vadd.f32 %v2005_v15, %v1974_v42 }
 0x3ae   :  { %2299 = vmatpush.msra.mxu3 %v1908_v55 }
 0x3b0   :  { %2300 = vmatpush.msra.mxu3 %v1905_v43 }
 0x3b2   :  { %2301 = vmatpush.msra.mxu3 %v1902_v39 }
 0x3b3   :  { %2260 = vmatmul.f32.gmra.mxu1 %v3497_v21  ;;  %v2008_v56 = vpop.f32.mrf.mxu3 }
 0x3b4   :  { %2302 = vmatpush.msra.mxu3 %v1899_v23  ;;  %2283 = vmatmul.f32.gmra.mxu2 %v3490_v29  ;;  %v2009_v27 = vadd.f32 %v2008_v56, %v1979_v40 }
 0x3b5   :  { %2303 = vmatmul.f32.vlgmr.msra.gmra.mxu3 %v3695_v35  ;;  %v2054_v35 = vpop.f32.mrf.mxu0 }
 0x3bb   :  { %v2028_v2 = vpop.f32.mrf.mxu3 }
 0x3bc   :  { %v2029_v13 = vadd.f32 %v2028_v2, %v2006_v28 }
 0x3bd   :  { %2306 = vmatmul.f32.gmra.mxu3 %v3712_v3  ;;  %v2143_v47 = vpop.f32.mrf.mxu0 }
 0x3be   :  { %v2052_v54 = vadd.f32 %v2051_v1, %v2029_v13 }
 0x3c3   :  { %v2031_v32 = vpop.f32.mrf.mxu3 }
 0x3c4   :  { %v2032_v45 = vadd.f32 %v2031_v32, %v2009_v27 }
 0x3c5   :  { %v2146_v0 = vpop.f32.mrf.mxu0 }
 0x3c6   :  { %v2055_v3 = vadd.f32 %v2054_v35, %v2032_v45 }
 0x3cb   :  { %v2120_v38 = vpop.f32.mrf.mxu3 }
 0x3cc   :  { %v2121_v53 = vadd.f32 %v2120_v38, %v1974_v42 }
 0x3cd   :  { %v2235_v58 = vpop.f32.mrf.mxu0 }
 0x3ce   :  { %v2144_v49 = vadd.f32 %v2143_v47, %v2121_v53  ;;  %v2236_v62 = vadd.f32 %v2235_v58, %v1974_v42 }
 0x3d3   :  { %v2123_v16 = vpop.f32.mrf.mxu3 }
 0x3d4   :  { %v2124_v59 = vadd.f32 %v2123_v16, %v1979_v40 }
 0x3d5   :  { %v2238_v20 = vpop.f32.mrf.mxu0 }
 0x3d6   :  { %v2147_v11 = vadd.f32 %v2146_v0, %v2124_v59  ;;  %v2239_v34 = vadd.f32 %v2238_v20, %v1979_v40 }
 0x3de   :  { %v2097_v37 = vpop.f32.mrf.mxu2 }
 0x3e6   :  { %v2100_v10 = vpop.f32.mrf.mxu2 }
 0x3e8   :  { %v2074_v21 = vpop.f32.mrf.mxu1 }
 0x3e9   :  { %v2075_v14 = vadd.f32 %v2074_v21, %v2052_v54 }
 0x3eb   :  { %v2098_v29 = vadd.f32 %v2097_v37, %v2075_v14 }
 0x3ed   :  { %v2333_v30 = vmax.f32 %v2098_v29, 0.0 }
 0x3ef   :  { %2339 = vst [vmem:[#allocation5] sm:$0xff] %v2333_v30 }
 0x3f0   :  { %v2077_v46 = vpop.f32.mrf.mxu1 }
 0x3f1   :  { %v2078_v8 = vadd.f32 %v2077_v46, %v2055_v3 }
 0x3f3   :  { %v2101_v31 = vadd.f32 %v2100_v10, %v2078_v8 }
 0x3f5   :  { %v2336_v4 = vmax.f32 %v2101_v31, 0.0 }
 0x3f7   :  { %2342 = vst [vmem:[#allocation5 + $0x18] sm:$0x3] %v2336_v4 }
 0x408   :  { %v2166_v52 = vpop.f32.mrf.mxu1 }
 0x409   :  { %v2167_v19 = vadd.f32 %v2166_v52, %v2144_v49 }
 0x40b   :  { %v2189_v9 = vpop.f32.mrf.mxu2 }
 0x40c   :  { %v2190_v57 = vadd.f32 %v2189_v9, %v2167_v19 }
 0x410   :  { %v2169_v51 = vpop.f32.mrf.mxu1 }
 0x411   :  { %v2170_v61 = vadd.f32 %v2169_v51, %v2147_v11 }
 0x413   :  { %v2192_v25 = vpop.f32.mrf.mxu2 }
 0x414   :  { %v2193_v22 = vadd.f32 %v2192_v25, %v2170_v61 }
 0x416   :  { %v2212_v12 = vpop.f32.mrf.mxu3 }
 0x417   :  { %v2213_v33 = vadd.f32 %v2212_v12, %v2190_v57 }
 0x418   :  { %v2327_v18 = vpop.f32.mrf.mxu0 }
 0x419   :  { %v2334_v48 = vmax.f32 %v2213_v33, 0.0 }
 0x41b   :  { %2340 = vst [vmem:[#allocation5 + $0x8] sm:$0xff] %v2334_v48 }
 0x41f   :  { %v2215_v6 = vpop.f32.mrf.mxu3 }
 0x420   :  { %v2216_v63 = vadd.f32 %v2215_v6, %v2193_v22 }
 0x421   :  { %v2330_v15 = vpop.f32.mrf.mxu0 }
 0x422   :  { %v2337_v41 = vmax.f32 %v2216_v63, 0.0 }
 0x424   :  { %2343 = vst [vmem:[#allocation5 + $0x20] sm:$0x3] %v2337_v41 }
 0x428   :  { %v2258_v26 = vpop.f32.mrf.mxu1 }
 0x429   :  { %v2259_v24 = vadd.f32 %v2258_v26, %v2236_v62 }
 0x42f   :  { %v2281_v7 = vpop.f32.mrf.mxu2 }
 0x430   :  { %v2282_v36 = vadd.f32 %v2281_v7, %v2259_v24  ;;  %v2261_v44 = vpop.f32.mrf.mxu1 }
 0x431   :  { %v2262_v50 = vadd.f32 %v2261_v44, %v2239_v34 }
 0x437   :  { %v2284_v55 = vpop.f32.mrf.mxu2 }
 0x438   :  { %v2304_v5 = vpop.f32.mrf.mxu3  ;;  %v2285_v39 = vadd.f32 %v2284_v55, %v2262_v50 }
 0x439   :  { %v2305_v17 = vadd.f32 %v2304_v5, %v2282_v36 }
 0x43b   :  { %v2328_v60 = vadd.f32 %v2327_v18, %v2305_v17 }
 0x43d   :  { %v2335_v43 = vmax.f32 %v2328_v60, 0.0 }
 0x43f   :  { %2341 = vst.msk [vmem:[#allocation5 + $0x10] sm:$0xff] %vm440_vm12, %v2335_v43 }
 0x440   :  { %v2307_v23 = vpop.f32.mrf.mxu3 }
 0x441   :  { %v2308_v56 = vadd.f32 %v2307_v23, %v2285_v39 }
 0x443   :  { %v2331_v42 = vadd.f32 %v2330_v15, %v2308_v56 }
 0x445   :  { %v2338_v28 = vmax.f32 %v2331_v42, 0.0 }
 0x447   :  { %2345 = vst.msk [vmem:[#allocation5 + $0x28] sm:$0x3] %vm2344_vm14, %v2338_v28 }
 0x448   :  { %2358 = dma.vmem_to_hbm [thread:$0]  %s2351_s16, 768, %s2353_s18, [#allocation6], %s2463_s21, %s2463_s21, %s2464_s1  }
 0x449   :  { %2450 = dma.done.wait [#allocation6], 768  }
 0x44a   :  { %2451 = vsyncadd [#allocation6], 4294966528 }
 0x44b   :  { %2363 = vsyncpa [#allocation6], 1 }

</bundles_post_ra>
